<compile_context>
chip_gen: v7x
topology: tpu7x:2x2x1
jax: 0.10.0
libtpu: 0.0.40
codegen_flags: <defaults>
</compile_context>

<pallas_src>
import jax
import jax.numpy as jnp
from jax.experimental import pallas as pl
from jax.experimental.pallas import tpu as pltpu

LEAKY_SLOPE = 0.2


# ----------------------------- Pallas kernels ------------------------------ #

def gemm_bias_lrelu_kernel(x_ref, w_ref, b_ref, o_ref):
    # x: (TILE_M, K) bf16, w: (K, Cout) bf16, b: (1, Cout) f32
    y = jnp.dot(x_ref[...], w_ref[...], preferred_element_type=jnp.float32)
    y = y + b_ref[...]
    y = jnp.maximum(y, LEAKY_SLOPE * y)            # LeakyReLU(0.2), slope in (0,1)
    o_ref[...] = y.astype(o_ref.dtype)


def conv3_fc_fused_kernel(p_ref, w3_ref, b3_ref, wfc_ref, sel_ref, bfc_ref, o_ref):
    # p:   (TILE_M, 1152) bf16  conv3 im2col patches (16 rows per image)
    # w3:  (1152, 256) bf16 ; b3: (1, 256) f32
    # wfc: (TILE_M, 256) f32    FC weight tiled once per image row-group (NHWC order)
    # sel: (NB, TILE_M)  f32    per-image row-group summation matrix (NB = TILE_M//16)
    # bfc: (1, 1) f32
    # o:   (NB, 1) f32
    y = jnp.dot(p_ref[...], w3_ref[...], preferred_element_type=jnp.float32)
    y = y + b3_ref[...]
    y = jnp.maximum(y, LEAKY_SLOPE * y)            # conv3 activation, stays in VMEM
    prod = y * wfc_ref[...]                        # (TILE_M, 256) f32
    per_img = jnp.dot(sel_ref[...], prod,
                      preferred_element_type=jnp.float32)      # (NB, 256)
    o_ref[...] = jnp.sum(per_img, axis=1, keepdims=True) + bfc_ref[...]


# ----------------------------- tiling / VMEM helpers ------------------------ #

def _cdiv(a, b):
    return -(-a // b)


def _round_up(x, m):
    return ((x + m - 1) // m) * m


def _plan_m_tiles(m, k, *, granule=16, max_tile_m=2048,
                  stream_budget_bytes=12 << 20, stream_bufs=2, min_steps=2):
    """Choose (tile_m, steps) for a row-streamed GEMM.

    K-aware cap (larger tiles for small K), >=2 steps when m allows (dual-TC v7x),
    balanced tiles so no nearly-empty padded tile is added.
    """
    cap = (stream_budget_bytes // (stream_bufs * k * 2)) // granule * granule
    cap = max(granule, min(cap, max_tile_m))
    steps = _cdiv(m, cap)
    if m >= 2 * granule:
        steps = max(steps, min_steps)
    tile = _round_up(_cdiv(m, steps), granule)
    return tile, steps


def _vmem_limit(*nbytes):
    est = 2 * sum(int(b) for b in nbytes)          # 2x headroom for compiler scratch
    return int(max(8 << 20, min(48 << 20, est)))


# ----------------------------- pallas_call wrappers ------------------------- #

def _conv_gemm(x, w, b):
    """LeakyReLU(x @ w + b), gridded over rows of x; weight/bias stay VMEM-resident."""
    m, k = x.shape
    cout = w.shape[1]
    tile, steps = _plan_m_tiles(m, k)
    m_pad = tile * steps
    if m_pad != m:
        x = jnp.pad(x, ((0, m_pad - m), (0, 0)))
    out = pl.pallas_call(
        gemm_bias_lrelu_kernel,
        out_shape=jax.ShapeDtypeStruct((m_pad, cout), jnp.bfloat16),
        grid=(steps,),
        in_specs=[
            pl.BlockSpec((tile, k), lambda i: (i, 0)),     # activation tiles stream
            pl.BlockSpec((k, cout), lambda i: (0, 0)),     # weight resident
            pl.BlockSpec((1, cout), lambda i: (0, 0)),     # bias resident
        ],
        out_specs=pl.BlockSpec((tile, cout), lambda i: (i, 0)),
        compiler_params=pltpu.CompilerParams(
            dimension_semantics=("parallel",),
            vmem_limit_bytes=_vmem_limit(
                2 * tile * k * 2,          # double-buffered input stream (bf16)
                2 * tile * cout * 2,       # double-buffered output (bf16)
                k * cout * 2, 4 * cout),   # resident weight + bias
        ),
    )(x, w, b)
    return out[:m] if m_pad != m else out


def _conv3_fc_fused(patches, w3, b3, wfc2d, bfc, n):
    """Fused conv3 (im2col GEMM + bias + LeakyReLU) + Linear(4096,1). Returns (n,1) f32."""
    m, k = patches.shape                            # m = n*16, k = 1152
    cout = w3.shape[1]                              # 256
    tile, steps = _plan_m_tiles(m, k)               # tile is a multiple of 16 -> whole images
    nb = tile // 16
    m_pad = tile * steps
    if m_pad != m:
        patches = jnp.pad(patches, ((0, m_pad - m), (0, 0)))
    # FC weight tiled once per image slot in the tile, and the per-image row-group
    # summation (selection) matrix; both VMEM-resident across the grid.
    wfc_tiled = jnp.tile(wfc2d, (nb, 1)).astype(jnp.float32)               # (tile, 256)
    row_img = jnp.arange(tile, dtype=jnp.int32) // 16
    sel = (jnp.arange(nb, dtype=jnp.int32)[:, None] == row_img[None, :]
           ).astype(jnp.float32)                                           # (nb, tile)
    bfc2 = bfc.reshape(1, 1).astype(jnp.float32)

    out = pl.pallas_call(
        conv3_fc_fused_kernel,
        out_shape=jax.ShapeDtypeStruct((steps, nb, 1), jnp.float32),
        grid=(steps,),
        in_specs=[
            pl.BlockSpec((tile, k), lambda i: (i, 0)),      # patch rows stream
            pl.BlockSpec((k, cout), lambda i: (0, 0)),      # conv3 weight resident
            pl.BlockSpec((1, cout), lambda i: (0, 0)),      # conv3 bias resident
            pl.BlockSpec((tile, cout), lambda i: (0, 0)),   # tiled FC weight resident
            pl.BlockSpec((nb, tile), lambda i: (0, 0)),     # selection matrix resident
            pl.BlockSpec((1, 1), lambda i: (0, 0)),         # FC bias
        ],
        out_specs=pl.BlockSpec((None, nb, 1), lambda i: (i, 0, 0)),
        compiler_params=pltpu.CompilerParams(
            dimension_semantics=("parallel",),
            vmem_limit_bytes=_vmem_limit(
                2 * tile * k * 2,                  # double-buffered patch stream
                k * cout * 2, 4 * cout,            # conv3 weight + bias
                tile * cout * 4,                   # tiled FC weight (f32)
                nb * tile * 4,                     # selection matrix (f32)
                2 * nb * 4),                       # output
        ),
    )(patches, w3, b3, wfc_tiled, sel, bfc2)
    return out.reshape(steps * nb, 1)[:n]


# ----------------------------- JAX glue (layout only) ---------------------- #

def conv_im2col_s2(x_nhwc):
    """im2col for Conv2d(k=3, stride=2, padding=1). Returns (N*Ho*Wo, 9*Cin)."""
    n, h, w, c = x_nhwc.shape
    ho, wo = h // 2, w // 2
    xp = jnp.pad(x_nhwc, ((0, 0), (1, 1), (1, 1), (0, 0)))
    taps = [xp[:, kh:kh + 2 * ho:2, kw:kw + 2 * wo:2, :]
            for kh in range(3) for kw in range(3)]
    patches = jnp.stack(taps, axis=3)                 # (N, Ho, Wo, 9, Cin)
    return patches.reshape(n * ho * wo, 9 * c), (n, ho, wo)


# ----------------------------- Parameters ----------------------------------- #

def init_params(key):
    ks = jax.random.split(key, 8)
    p = {}
    p["conv1_w"] = 0.05 * jax.random.normal(ks[0], (64, 3, 3, 3), jnp.float32)
    p["conv1_b"] = 0.01 * jax.random.normal(ks[1], (64,), jnp.float32)
    p["conv2_w"] = 0.05 * jax.random.normal(ks[2], (128, 64, 3, 3), jnp.float32)
    p["conv2_b"] = 0.01 * jax.random.normal(ks[3], (128,), jnp.float32)
    p["conv3_w"] = 0.05 * jax.random.normal(ks[4], (256, 128, 3, 3), jnp.float32)
    p["conv3_b"] = 0.01 * jax.random.normal(ks[5], (256,), jnp.float32)
    p["fc_w"] = 0.05 * jax.random.normal(ks[6], (1, 256 * 4 * 4), jnp.float32)
    p["fc_b"] = 0.01 * jax.random.normal(ks[7], (1,), jnp.float32)
    return p


def prepare_params(p):
    """One-time layout prep: conv weights -> GEMM matrices (kh,kw,cin ordering),
    FC weight reordered from the PyTorch NCHW flatten (c*16 + h*4 + w) into a
    (16 spatial, 256 channel) NHWC-ordered matrix, bf16 casts for MXU operands."""
    gp = {}
    for i, cin, cout in ((1, 3, 64), (2, 64, 128), (3, 128, 256)):
        w = p[f"conv{i}_w"]                                   # (Cout, Cin, 3, 3)
        w_mat = jnp.transpose(w, (2, 3, 1, 0)).reshape(9 * cin, cout)
        gp[f"w{i}"] = w_mat.astype(jnp.bfloat16)
        gp[f"b{i}"] = p[f"conv{i}_b"].reshape(1, cout).astype(jnp.float32)
    gp["w_fc2d"] = (p["fc_w"].reshape(256, 4, 4).transpose(1, 2, 0)
                    .reshape(16, 256).astype(jnp.float32))    # [h*4+w, c]
    gp["b_fc"] = p["fc_b"].astype(jnp.float32)
    return gp


# ----------------------------- Discriminator ------------------------------- #

@jax.jit
def discriminator_forward(gp, x_nchw):
    n = x_nchw.shape[0]
    h = jnp.transpose(x_nchw, (0, 2, 3, 1)).astype(jnp.bfloat16)  # NCHW -> NHWC
    # conv1, conv2: im2col + streamed GEMM with fused bias + LeakyReLU
    for i, cout in ((1, 64), (2, 128)):
        patches, (nb, ho, wo) = conv_im2col_s2(h)
        y = _conv_gemm(patches, gp[f"w{i}"], gp[f"b{i}"])
        h = y.reshape(nb, ho, wo, cout)
    # conv3 + Linear fused into one kernel (in-VMEM handoff of the conv3 activation)
    patches, _ = conv_im2col_s2(h)                                # (n*16, 1152)
    return _conv3_fc_fused(patches, gp["w3"], gp["b3"], gp["w_fc2d"], gp["b_fc"], n)


# ----------------------------- pure-JAX reference --------------------------- #

def ref_forward(p, x_nchw):
    h = x_nchw
    for i in (1, 2, 3):
        h = jax.lax.conv_general_dilated(
            h, p[f"conv{i}_w"], window_strides=(2, 2),
            padding=((1, 1), (1, 1)),
            dimension_numbers=("NCHW", "OIHW", "NCHW"))
        h = h + p[f"conv{i}_b"].reshape(1, -1, 1, 1)
        h = jnp.where(h >= 0.0, h, LEAKY_SLOPE * h)
    hf = h.reshape(h.shape[0], -1)                                # NCHW flatten
    return hf @ p["fc_w"].T + p["fc_b"]


if __name__ == "__main__":
    key = jax.random.PRNGKey(0)
    k_param, k_x = jax.random.split(key)
    params = init_params(k_param)
    gemm_params = prepare_params(params)

    batch = 2
    x = jax.random.normal(k_x, (batch, 3, 32, 32), jnp.float32)   # [N, 3, 32, 32]

    out = discriminator_forward(gemm_params, x)
    out = jax.block_until_ready(out)

    assert out.shape == (batch, 1), out.shape
    assert out.dtype == jnp.float32
    assert bool(jnp.all(jnp.isfinite(out)))

    # loose sanity check vs. a pure-JAX f32 reference (bf16 matmul operands in the
    # Pallas path => small numeric differences expected; this catches layout bugs).
    ref = ref_forward(params, x)
    err = float(jnp.max(jnp.abs(out - ref)))
    scale = 1.0 + float(jnp.max(jnp.abs(ref)))
    assert err <= 0.1 * scale, (err, scale)

    print("KERNEL_OK")
</pallas_src>

<mosaic_0001>
module attributes {stable_mosaic.version = 11 : i64} {
  func.func @gemm_bias_lrelu_kernel(%arg0: i32, %arg1: memref<256x27xbf16, #tpu.memory_space<vmem>>, %arg2: memref<27x64xbf16, #tpu.memory_space<vmem>>, %arg3: memref<1x64xf32, #tpu.memory_space<vmem>>, %arg4: memref<256x64xbf16, #tpu.memory_space<vmem>>) attributes {dimension_semantics = [#tpu.dimension_semantics<parallel>], iteration_bounds = array<i64: 2>, scalar_prefetch = 0 : i64, scratch_operands = 0 : i64, tpu.core_type = #tpu.core_type<tc>, window_params = [{transform_indices = @transform_0, window_bounds = array<i64: 256, 27>}, {pipeline_mode = #tpu.pipeline_mode<synchronous>, transform_indices = @transform_1, window_bounds = array<i64: 27, 64>}, {pipeline_mode = #tpu.pipeline_mode<synchronous>, transform_indices = @transform_2, window_bounds = array<i64: 1, 64>}, {transform_indices = @transform_3, window_bounds = array<i64: 256, 64>}]} {
    %c0 = arith.constant 0 : index
    %c0_0 = arith.constant 0 : index
    %0 = vector.load %arg1[%c0, %c0_0] : memref<256x27xbf16, #tpu.memory_space<vmem>>, vector<256x27xbf16>
    %c0_1 = arith.constant 0 : index
    %c0_2 = arith.constant 0 : index
    %1 = vector.load %arg2[%c0_1, %c0_2] : memref<27x64xbf16, #tpu.memory_space<vmem>>, vector<27x64xbf16>
    %cst = arith.constant dense<0.000000e+00> : vector<256x64xf32>
    %2 = tpu.matmul %0, %1, %cst {dimension_numbers = #tpu.dot_dimension_numbers<[1], [0], [0], [1], [0, 0, 1, 1], [], []>} : vector<256x27xbf16>, vector<27x64xbf16>, vector<256x64xf32> -> vector<256x64xf32>
    %c0_3 = arith.constant 0 : index
    %c0_4 = arith.constant 0 : index
    %3 = vector.load %arg3[%c0_3, %c0_4] : memref<1x64xf32, #tpu.memory_space<vmem>>, vector<1x64xf32>
    %4 = vector.broadcast %3 : vector<1x64xf32> to vector<256x64xf32>
    %5 = arith.addf %2, %4 : vector<256x64xf32>
    %cst_5 = arith.constant 2.000000e-01 : f32
    %6 = vector.broadcast %cst_5 : f32 to vector<256x64xf32>
    %7 = arith.mulf %6, %5 : vector<256x64xf32>
    %8 = arith.maximumf %5, %7 : vector<256x64xf32>
    %9 = arith.truncf %8 : vector<256x64xf32> to vector<256x64xbf16>
    %c0_6 = arith.constant 0 : index
    %c0_7 = arith.constant 0 : index
    %10 = vector.load %arg4[%c0_6, %c0_7] : memref<256x64xbf16, #tpu.memory_space<vmem>>, vector<256x64xbf16>
    tpu.vector_store %arg4[%c0_6, %c0_7], %9 {strides = array<i32>} : memref<256x64xbf16, #tpu.memory_space<vmem>>, vector<256x64xbf16>,
    return
  }
  func.func @transform_0(%arg0: i32) -> (i32, i32) {
    %c0_i32 = arith.constant 0 : i32
    %c0_i32_0 = arith.constant 0 : i32
    return %arg0, %c0_i32 : i32, i32
  }
  func.func @transform_1(%arg0: i32) -> (i32, i32) {
    %c0_i32 = arith.constant 0 : i32
    %c0_i32_0 = arith.constant 0 : i32
    %c0_i32_1 = arith.constant 0 : i32
    return %c0_i32, %c0_i32_0 : i32, i32
  }
  func.func @transform_2(%arg0: i32) -> (i32, i32) {
    %c0_i32 = arith.constant 0 : i32
    %c0_i32_0 = arith.constant 0 : i32
    %c0_i32_1 = arith.constant 0 : i32
    return %c0_i32, %c0_i32_0 : i32, i32
  }
  func.func @transform_3(%arg0: i32) -> (i32, i32) {
    %c0_i32 = arith.constant 0 : i32
    %c0_i32_0 = arith.constant 0 : i32
    return %arg0, %c0_i32 : i32, i32
  }
}

module attributes {stable_mosaic.version = 11 : i64} {
  func.func @gemm_bias_lrelu_kernel(%arg0: i32, %arg1: memref<64x576xbf16, #tpu.memory_space<vmem>>, %arg2: memref<576x128xbf16, #tpu.memory_space<vmem>>, %arg3: memref<1x128xf32, #tpu.memory_space<vmem>>, %arg4: memref<64x128xbf16, #tpu.memory_space<vmem>>) attributes {dimension_semantics = [#tpu.dimension_semantics<parallel>], iteration_bounds = array<i64: 2>, scalar_prefetch = 0 : i64, scratch_operands = 0 : i64, tpu.core_type = #tpu.core_type<tc>, window_params = [{transform_indices = @transform_0, window_bounds = array<i64: 64, 576>}, {pipeline_mode = #tpu.pipeline_mode<synchronous>, transform_indices = @transform_1, window_bounds = array<i64: 576, 128>}, {pipeline_mode = #tpu.pipeline_mode<synchronous>, transform_indices = @transform_2, window_bounds = array<i64: 1, 128>}, {transform_indices = @transform_3, window_bounds = array<i64: 64, 128>}]} {
    %c0 = arith.constant 0 : index
    %c0_0 = arith.constant 0 : index
    %0 = vector.load %arg1[%c0, %c0_0] : memref<64x576xbf16, #tpu.memory_space<vmem>>, vector<64x576xbf16>
    %c0_1 = arith.constant 0 : index
    %c0_2 = arith.constant 0 : index
    %1 = vector.load %arg2[%c0_1, %c0_2] : memref<576x128xbf16, #tpu.memory_space<vmem>>, vector<576x128xbf16>
    %cst = arith.constant dense<0.000000e+00> : vector<64x128xf32>
    %2 = tpu.matmul %0, %1, %cst {dimension_numbers = #tpu.dot_dimension_numbers<[1], [0], [0], [1], [0, 0, 1, 1], [], []>} : vector<64x576xbf16>, vector<576x128xbf16>, vector<64x128xf32> -> vector<64x128xf32>
    %c0_3 = arith.constant 0 : index
    %c0_4 = arith.constant 0 : index
    %3 = vector.load %arg3[%c0_3, %c0_4] : memref<1x128xf32, #tpu.memory_space<vmem>>, vector<1x128xf32>
    %4 = vector.broadcast %3 : vector<1x128xf32> to vector<64x128xf32>
    %5 = arith.addf %2, %4 : vector<64x128xf32>
    %cst_5 = arith.constant 2.000000e-01 : f32
    %6 = vector.broadcast %cst_5 : f32 to vector<64x128xf32>
    %7 = arith.mulf %6, %5 : vector<64x128xf32>
    %8 = arith.maximumf %5, %7 : vector<64x128xf32>
    %9 = arith.truncf %8 : vector<64x128xf32> to vector<64x128xbf16>
    %c0_6 = arith.constant 0 : index
    %c0_7 = arith.constant 0 : index
    %10 = vector.load %arg4[%c0_6, %c0_7] : memref<64x128xbf16, #tpu.memory_space<vmem>>, vector<64x128xbf16>
    tpu.vector_store %arg4[%c0_6, %c0_7], %9 {strides = array<i32>} : memref<64x128xbf16, #tpu.memory_space<vmem>>, vector<64x128xbf16>,
    return
  }
  func.func @transform_0(%arg0: i32) -> (i32, i32) {
    %c0_i32 = arith.constant 0 : i32
    %c0_i32_0 = arith.constant 0 : i32
    return %arg0, %c0_i32 : i32, i32
  }
  func.func @transform_1(%arg0: i32) -> (i32, i32) {
    %c0_i32 = arith.constant 0 : i32
    %c0_i32_0 = arith.constant 0 : i32
    %c0_i32_1 = arith.constant 0 : i32
    return %c0_i32, %c0_i32_0 : i32, i32
  }
  func.func @transform_2(%arg0: i32) -> (i32, i32) {
    %c0_i32 = arith.constant 0 : i32
    %c0_i32_0 = arith.constant 0 : i32
    %c0_i32_1 = arith.constant 0 : i32
    return %c0_i32, %c0_i32_0 : i32, i32
  }
  func.func @transform_3(%arg0: i32) -> (i32, i32) {
    %c0_i32 = arith.constant 0 : i32
    %c0_i32_0 = arith.constant 0 : i32
    return %arg0, %c0_i32 : i32, i32
  }
}

module attributes {stable_mosaic.version = 11 : i64} {
  func.func @conv3_fc_fused_kernel(%arg0: i32, %arg1: memref<16x1152xbf16, #tpu.memory_space<vmem>>, %arg2: memref<1152x256xbf16, #tpu.memory_space<vmem>>, %arg3: memref<1x256xf32, #tpu.memory_space<vmem>>, %arg4: memref<16x256xf32, #tpu.memory_space<vmem>>, %arg5: memref<1x16xf32, #tpu.memory_space<vmem>>, %arg6: memref<1x1xf32, #tpu.memory_space<vmem>>, %arg7: memref<1x1x1xf32, #tpu.memory_space<vmem>>) attributes {dimension_semantics = [#tpu.dimension_semantics<parallel>], iteration_bounds = array<i64: 2>, scalar_prefetch = 0 : i64, scratch_operands = 0 : i64, tpu.core_type = #tpu.core_type<tc>, window_params = [{transform_indices = @transform_0, window_bounds = array<i64: 16, 1152>}, {pipeline_mode = #tpu.pipeline_mode<synchronous>, transform_indices = @transform_1, window_bounds = array<i64: 1152, 256>}, {pipeline_mode = #tpu.pipeline_mode<synchronous>, transform_indices = @transform_2, window_bounds = array<i64: 1, 256>}, {pipeline_mode = #tpu.pipeline_mode<synchronous>, transform_indices = @transform_3, window_bounds = array<i64: 16, 256>}, {pipeline_mode = #tpu.pipeline_mode<synchronous>, transform_indices = @transform_4, window_bounds = array<i64: 1, 16>}, {pipeline_mode = #tpu.pipeline_mode<synchronous>, transform_indices = @transform_5, window_bounds = array<i64: 1, 1>}, {transform_indices = @transform_6, window_bounds = array<i64: 1, 1, 1>}]} {
    %c0 = arith.constant 0 : index
    %c0_0 = arith.constant 0 : index
    %0 = vector.load %arg1[%c0, %c0_0] : memref<16x1152xbf16, #tpu.memory_space<vmem>>, vector<16x1152xbf16>
    %c0_1 = arith.constant 0 : index
    %c0_2 = arith.constant 0 : index
    %1 = vector.load %arg2[%c0_1, %c0_2] : memref<1152x256xbf16, #tpu.memory_space<vmem>>, vector<1152x256xbf16>
    %cst = arith.constant dense<0.000000e+00> : vector<16x256xf32>
    %2 = tpu.matmul %0, %1, %cst {dimension_numbers = #tpu.dot_dimension_numbers<[1], [0], [0], [1], [0, 0, 1, 1], [], []>} : vector<16x1152xbf16>, vector<1152x256xbf16>, vector<16x256xf32> -> vector<16x256xf32>
    %c0_3 = arith.constant 0 : index
    %c0_4 = arith.constant 0 : index
    %3 = vector.load %arg3[%c0_3, %c0_4] : memref<1x256xf32, #tpu.memory_space<vmem>>, vector<1x256xf32>
    %4 = vector.broadcast %3 : vector<1x256xf32> to vector<16x256xf32>
    %5 = arith.addf %2, %4 : vector<16x256xf32>
    %cst_5 = arith.constant 2.000000e-01 : f32
    %6 = vector.broadcast %cst_5 : f32 to vector<16x256xf32>
    %7 = arith.mulf %6, %5 : vector<16x256xf32>
    %8 = arith.maximumf %5, %7 : vector<16x256xf32>
    %c0_6 = arith.constant 0 : index
    %c0_7 = arith.constant 0 : index
    %9 = vector.load %arg4[%c0_6, %c0_7] : memref<16x256xf32, #tpu.memory_space<vmem>>, vector<16x256xf32>
    %10 = arith.mulf %8, %9 : vector<16x256xf32>
    %c0_8 = arith.constant 0 : index
    %c0_9 = arith.constant 0 : index
    %11 = vector.load %arg5[%c0_8, %c0_9] : memref<1x16xf32, #tpu.memory_space<vmem>>, vector<1x16xf32>
    %cst_10 = arith.constant dense<0.000000e+00> : vector<1x256xf32>
    %12 = tpu.matmul %11, %10, %cst_10 {dimension_numbers = #tpu.dot_dimension_numbers<[1], [0], [0], [1], [0, 0, 1, 1], [], []>} : vector<1x16xf32>, vector<16x256xf32>, vector<1x256xf32> -> vector<1x256xf32>
    %cst_11 = arith.constant dense<0.000000e+00> : vector<1xf32>
    %13 = vector.multi_reduction <add>, %12, %cst_11 [1] : vector<1x256xf32> to vector<1xf32>
    %14 = vector.shape_cast %13 : vector<1xf32> to vector<1x1xf32>
    %c0_12 = arith.constant 0 : index
    %c0_13 = arith.constant 0 : index
    %15 = vector.load %arg6[%c0_12, %c0_13] : memref<1x1xf32, #tpu.memory_space<vmem>>, vector<1x1xf32>
    %16 = arith.addf %14, %15 : vector<1x1xf32>
    %c0_14 = arith.constant 0 : index
    %c0_15 = arith.constant 0 : index
    %c0_16 = arith.constant 0 : index
    %17 = vector.load %arg7[%c0_14, %c0_15, %c0_16] : memref<1x1x1xf32, #tpu.memory_space<vmem>>, vector<1x1x1xf32>
    %18 = vector.shape_cast %17 : vector<1x1x1xf32> to vector<1x1xf32>
    %19 = vector.shape_cast %16 : vector<1x1xf32> to vector<1x1x1xf32>
    tpu.vector_store %arg7[%c0_14, %c0_15, %c0_16], %19 {strides = array<i32>} : memref<1x1x1xf32, #tpu.memory_space<vmem>>, vector<1x1x1xf32>,
    return
  }
  func.func @transform_0(%arg0: i32) -> (i32, i32) {
    %c0_i32 = arith.constant 0 : i32
    %c0_i32_0 = arith.constant 0 : i32
    return %arg0, %c0_i32 : i32, i32
  }
  func.func @transform_1(%arg0: i32) -> (i32, i32) {
    %c0_i32 = arith.constant 0 : i32
    %c0_i32_0 = arith.constant 0 : i32
    %c0_i32_1 = arith.constant 0 : i32
    return %c0_i32, %c0_i32_0 : i32, i32
  }
  func.func @transform_2(%arg0: i32) -> (i32, i32) {
    %c0_i32 = arith.constant 0 : i32
    %c0_i32_0 = arith.constant 0 : i32
    %c0_i32_1 = arith.constant 0 : i32
    return %c0_i32, %c0_i32_0 : i32, i32
  }
  func.func @transform_3(%arg0: i32) -> (i32, i32) {
    %c0_i32 = arith.constant 0 : i32
    %c0_i32_0 = arith.constant 0 : i32
    %c0_i32_1 = arith.constant 0 : i32
    return %c0_i32, %c0_i32_0 : i32, i32
  }
  func.func @transform_4(%arg0: i32) -> (i32, i32) {
    %c0_i32 = arith.constant 0 : i32
    %c0_i32_0 = arith.constant 0 : i32
    %c0_i32_1 = arith.constant 0 : i32
    return %c0_i32, %c0_i32_0 : i32, i32
  }
  func.func @transform_5(%arg0: i32) -> (i32, i32) {
    %c0_i32 = arith.constant 0 : i32
    %c0_i32_0 = arith.constant 0 : i32
    %c0_i32_1 = arith.constant 0 : i32
    return %c0_i32, %c0_i32_0 : i32, i32
  }
  func.func @transform_6(%arg0: i32) -> (i32, i32, i32) {
    %c0_i32 = arith.constant 0 : i32
    %c0_i32_0 = arith.constant 0 : i32
    %c0_i32_1 = arith.constant 0 : i32
    return %arg0, %c0_i32, %c0_i32_0 : i32, i32, i32
  }
}

</mosaic_0001>

<bundles_post_ra>
// kernel: discriminator_forward.3
= control target key start
LH: loop header
LB: loop body
LE: loop exit
PB: predicated region body
PF: predicated region fallthrough
CT: control target
= control target key end

     0   :  { %s1031_s12 = smov 0   ;;  %s1198_s0 = inlined_call_operand.vmem [shape: bf16[512,27], index: 0, kind: input, shape index: {}]   ;;  %s1199_s1 = inlined_call_operand.vmem [shape: bf16[27,64], index: 1, kind: input, shape index: {}]   ;;  %s1200_s2 = inlined_call_operand.vmem [shape: f32[1,64], index: 2, kind: input, shape index: {}]   ;;  %s1201_s3 = inlined_call_operand.vmem [shape: bf16[512,64], index: 3, kind: output, shape index: {}]  }
   0x1 LB: > { %s807_s13 = sadd.s32 4294967295, %s1008_s12   ;;  %p811_p0 = scmp.ge.s32.totalorder %s1008_s12, 1  ;;  %s1008_s12 = sphi %s1031_s12, %s13_s12  }
   0x2   : > { %p138_p1 = scmp.lt.s32.totalorder %s1008_s12, 3 }
   0x4   : > { %p139_p2 = pnand %p811_p0, %p138_p1 }
   0x5   : > { %v984_v0 = vld [vmem:[%s1199_s1] sm:$0xff] (!%p139_p2)   ;;  %vm358_vm0 = vcmask (!%p139_p2), 1044480   ;;  %v985_v1 = vld [vmem:[%s1199_s1 + $0x8] sm:$0x3f] (!%p139_p2)   ;;  %vm359_vm1 = vcmask (!%p139_p2), 1045504   ;;  %s812_s18 = sshll.u32 (!%p139_p2), %s807_s13, 5 }
   0x6   : > { %142 = sbr.rel (%p139_p2) target bundleno = 269 (0x10d), region = 32  ;;  %935 = vmatprep.subr.bf16.mxu0 (!%p139_p2), %v984_v0  ;;  %971 = vmatprep.subr.bf16.mxu1 (!%p139_p2), %v984_v0  ;;  %v1010_v2 = vmov (!%p139_p2), 65535   ;;  %p163_p3 = scmp.lt.s32.totalorder (!%p139_p2), %s812_s18, 63  ;;  %vm309_vm2 = vcmask (!%p139_p2), 220160   ;;  %v1090_v22 = vld [vmem:[%s1200_s2] ss:$0 sm:$0xff] (!%p139_p2) }
   0x7   : > { %936 = vmatpush3.bf16.msra.mxu0 (!%p139_p2), %v984_v0  ;;  %973 = vmatpush3.bf16.msra.mxu1 (!%p139_p2), %v984_v0  ;;  %v360_v3 = vsel (!%p139_p2), %vm358_vm0, 4294967295, %v1010_v2  ;;  %vm718_vm3 = vcmask (!%p139_p2), 519168  }
   0x8   : > { %v361_v4 = vsel (!%p139_p2), %vm359_vm1, %v360_v3, 0 }
   0x9   : > { %v363_v5 = vand.u32 (!%p139_p2), %v985_v1, %v361_v4 }
   0xb   : > { %937 = vmatprep.subr.bf16.mxu0 (!%p139_p2), %v363_v5  ;;  %972 = vmatprep.subr.bf16.mxu1 (!%p139_p2), %v363_v5 }
   0xc   : > { %938 = vmatpush3.bf16.msra.mxu0 (!%p139_p2), %v363_v5  ;;  %974 = vmatpush3.bf16.msra.mxu1 (!%p139_p2), %v363_v5 }
   0xd   : > { %s1203_s18 = smov (!%p163_p3, %s812_s18), 63 }
   0xe   : > { %s813_s19 = sshll.u32 %s1203_s18, 2 }
   0xf   : > { %s1053_s22 = scalar_lea.vmem %s1198_s0, %s813_s19  ;;  %s1105_s27 = scalar_lea.vmem %s1201_s3, %s813_s19 }
  0x10   : > { %v986_v6 = vld [vmem:[%s1053_s22] sm:$0xff]   ;;  %v988_v8 = vld [vmem:[%s1053_s22 + $0x8] sm:$0xff]   ;;  %v990_v10 = vld [vmem:[%s1053_s22 + $0x10] sm:$0xff]  }
  0x11   : > { %v987_v7 = vld [vmem:[%s1053_s22 + $0x40] sm:$0xff]   ;;  %939 = vmatprep.mubr.msk.bf16.mxu0 %vm309_vm2, %v986_v6  ;;  %v989_v9 = vld [vmem:[%s1053_s22 + $0x48] sm:$0xff]   ;;  %v991_v11 = vld [vmem:[%s1053_s22 + $0x50] sm:$0xff]  }
  0x12   : > { %955 = vmatprep.mubr.msk.bf16.mxu1 %vm309_vm2, %v987_v7  ;;  %940 = vmatmul.mubr.msk.bf16.vlgmr.msra.gmra.mrb[0].mxu0 %vm309_vm2, %v988_v8  ;;  %v992_v12 = vld [vmem:[%s1053_s22 + $0x18] sm:$0xff]   ;;  %v994_v14 = vld [vmem:[%s1053_s22 + $0x20] sm:$0xff]   ;;  %v996_v16 = vld [vmem:[%s1053_s22 + $0x28] sm:$0xff]  }
  0x13   : > { %956 = vmatmul.mubr.msk.bf16.vlgmr.msra.gmra.mrb[0].mxu1 %vm309_vm2, %v989_v9  ;;  %943 = vmatprep.mubr.msk.bf16.mxu0 %vm309_vm2, %v990_v10  ;;  %v993_v13 = vld [vmem:[%s1053_s22 + $0x58] sm:$0xff]   ;;  %v995_v15 = vld [vmem:[%s1053_s22 + $0x60] sm:$0xff]   ;;  %v997_v17 = vld [vmem:[%s1053_s22 + $0x68] sm:$0xff]  }
  0x14   : > { %959 = vmatprep.mubr.msk.bf16.mxu1 %vm309_vm2, %v991_v11  ;;  %v998_v18 = vld [vmem:[%s1053_s22 + $0x30] sm:$0xff]   ;;  %v1000_v20 = vld [vmem:[%s1053_s22 + $0x38] sm:$0xff]  }
  0x15   : > { %v999_v19 = vld [vmem:[%s1053_s22 + $0x70] sm:$0xff]   ;;  %v1001_v21 = vld [vmem:[%s1053_s22 + $0x78] sm:$0xff]  }
  0x1a   : > { %944 = vmatmul.mubr.msk.bf16.gmra.mrb[4].mxu0 %vm309_vm2, %v992_v12 }
  0x1b   : > { %960 = vmatmul.mubr.msk.bf16.gmra.mrb[4].mxu1 %vm309_vm2, %v993_v13  ;;  %947 = vmatprep.mubr.msk.bf16.mxu0 %vm309_vm2, %v994_v14 }
  0x1c   : > { %963 = vmatprep.mubr.msk.bf16.mxu1 %vm309_vm2, %v995_v15 }
  0x22   : > { %948 = vmatmul.mubr.msk.bf16.gmra.mrb[8].mxu0 %vm309_vm2, %v996_v16 }
  0x23   : > { %964 = vmatmul.mubr.msk.bf16.gmra.mrb[8].mxu1 %vm309_vm2, %v997_v17  ;;  %951 = vmatprep.mubr.msk.bf16.mxu0 %vm309_vm2, %v998_v18 }
  0x24   : > { %967 = vmatprep.mubr.msk.bf16.mxu1 %vm309_vm2, %v999_v19 }
  0x2a   : > { %952 = vmatmul.mubr.msk.bf16.gmra.mrb[12].mxu0 %vm309_vm2, %v1000_v20 }
  0x2b   : > { %968 = vmatmul.mubr.msk.bf16.gmra.mrb[12].mxu1 %vm309_vm2, %v1001_v21 }
  0xe5   : > { %v941_v23 = vpop.f32.mrb[0].mxu0 }
  0xe6   : > { %v408_v24 = vadd.f32 %v941_v23, %v1090_v22  ;;  %v957_v25 = vpop.f32.mrb[0].mxu1  ;;  %v399_v26 = vpop.f32.mrb[1].mxu0 }
  0xe7   : > { %v472_v27 = vadd.f32 %v957_v25, %v1090_v22  ;;  %v400_v28 = vadd.f32 %v1090_v22, %v399_v26  ;;  %v463_v29 = vpop.f32.mrb[1].mxu1  ;;  %v942_v30 = vpop.f32.mrb[2].mxu0 }
  0xe8   : > { %v528_v31 = vmul.f32 0.2, %v408_v24  ;;  %v464_v32 = vadd.f32 %v1090_v22, %v463_v29  ;;  %v411_v33 = vadd.f32 %v942_v30, %v1090_v22  ;;  %v958_v34 = vpop.f32.mrb[2].mxu1  ;;  %v402_v35 = vpop.f32.mrb[3].mxu0 }
  0xe9   : > { %v544_v36 = vmul.f32 0.2, %v472_v27  ;;  %v526_v37 = vmul.f32 0.2, %v400_v28  ;;  %v475_v38 = vadd.f32 %v958_v34, %v1090_v22  ;;  %v403_v39 = vadd.f32 %v1090_v22, %v402_v35  ;;  %v466_v40 = vpop.f32.mrb[3].mxu1 }
  0xea   : > { %v560_v41 = vmax.f32 %v408_v24, %v528_v31  ;;  %v542_v42 = vmul.f32 0.2, %v464_v32  ;;  %v529_v43 = vmul.f32 0.2, %v411_v33  ;;  %v467_v44 = vadd.f32 %v1090_v22, %v466_v40 }
  0xeb   : > { %v576_v45 = vmax.f32 %v472_v27, %v544_v36  ;;  %v558_v46 = vmax.f32 %v400_v28, %v526_v37  ;;  %v545_v47 = vmul.f32 0.2, %v475_v38  ;;  %v527_v48 = vmul.f32 0.2, %v403_v39 }
  0xec   : > { %v887_v49 = vpack.c.bf16 %v560_v41, %v560_v41  ;;  %v574_v50 = vmax.f32 %v464_v32, %v542_v42  ;;  %v561_v51 = vmax.f32 %v411_v33, %v529_v43  ;;  %v543_v52 = vmul.f32 0.2, %v467_v44 }
  0xed   : > { %v903_v53 = vpack.c.bf16 %v576_v45, %v576_v45  ;;  %v885_v54 = vpack.c.bf16 %v558_v46, %v558_v46  ;;  %v577_v55 = vmax.f32 %v475_v38, %v545_v47  ;;  %v559_v56 = vmax.f32 %v403_v39, %v527_v48  ;;  %v945_v57 = vpop.f32.mrb[4].mxu0 }
  0xee   : > { %721 = vst.msk [vmem:[%s1105_s27 + $0x8] sm:$0xf] %vm718_vm3, %v887_v49  ;;  %v901_v58 = vpack.c.bf16 %v574_v50, %v574_v50  ;;  %v888_v59 = vpack.c.bf16 %v561_v51, %v561_v51  ;;  %v575_v60 = vmax.f32 %v467_v44, %v543_v52  ;;  %v424_v61 = vadd.f32 %v945_v57, %v1090_v22  ;;  %v961_v62 = vpop.f32.mrb[4].mxu1  ;;  %v415_v63 = vpop.f32.mrb[5].mxu0 }
  0xef   : > { %737 = vst.msk [vmem:[%s1105_s27 + $0x48] sm:$0xf] %vm718_vm3, %v903_v53  ;;  %719 = vst.msk [vmem:[%s1105_s27] sm:$0xf] %vm718_vm3, %v885_v54  ;;  %v904_v0 = vpack.c.bf16 %v577_v55, %v577_v55  ;;  %v886_v1 = vpack.c.bf16 %v559_v56, %v559_v56  ;;  %v488_v2 = vadd.f32 %v961_v62, %v1090_v22  ;;  %v479_v4 = vpop.f32.mrb[5].mxu1  ;;  %v946_v5 = vpop.f32.mrb[6].mxu0 }
  0xf0   : > { %v416_v3 = vadd.f32 %v1090_v22, %v415_v63  ;;  %735 = vst.msk [vmem:[%s1105_s27 + $0x40] sm:$0xf] %vm718_vm3, %v901_v58  ;;  %722 = vst.msk [vmem:[%s1105_s27 + $0xc] sm:$0xf] %vm718_vm3, %v888_v59  ;;  %v902_v6 = vpack.c.bf16 %v575_v60, %v575_v60  ;;  %v532_v7 = vmul.f32 0.2, %v424_v61  ;;  %v480_v8 = vadd.f32 %v1090_v22, %v479_v4 }
  0xf1   : > { %v427_v9 = vadd.f32 %v946_v5, %v1090_v22  ;;  %v962_v10 = vpop.f32.mrb[6].mxu1  ;;  %v418_v11 = vpop.f32.mrb[7].mxu0  ;;  %738 = vst.msk [vmem:[%s1105_s27 + $0x4c] sm:$0xf] %vm718_vm3, %v904_v0  ;;  %720 = vst.msk [vmem:[%s1105_s27 + $0x4] sm:$0xf] %vm718_vm3, %v886_v1 }
  0xf2   : > { %v548_v12 = vmul.f32 0.2, %v488_v2  ;;  %v530_v13 = vmul.f32 0.2, %v416_v3  ;;  %v491_v14 = vadd.f32 %v962_v10, %v1090_v22  ;;  %v419_v15 = vadd.f32 %v1090_v22, %v418_v11  ;;  %v482_v16 = vpop.f32.mrb[7].mxu1 }
  0xf3   : > { %736 = vst.msk [vmem:[%s1105_s27 + $0x44] sm:$0xf] %vm718_vm3, %v902_v6  ;;  %v564_v17 = vmax.f32 %v424_v61, %v532_v7  ;;  %v546_v18 = vmul.f32 0.2, %v480_v8  ;;  %v533_v19 = vmul.f32 0.2, %v427_v9  ;;  %v483_v20 = vadd.f32 %v1090_v22, %v482_v16 }
  0xf4   : > { %v580_v21 = vmax.f32 %v488_v2, %v548_v12  ;;  %v562_v23 = vmax.f32 %v416_v3, %v530_v13  ;;  %v549_v24 = vmul.f32 0.2, %v491_v14  ;;  %v531_v25 = vmul.f32 0.2, %v419_v15 }
  0xf5   : > { %v891_v26 = vpack.c.bf16 %v564_v17, %v564_v17  ;;  %v578_v27 = vmax.f32 %v480_v8, %v546_v18  ;;  %v565_v28 = vmax.f32 %v427_v9, %v533_v19  ;;  %v547_v29 = vmul.f32 0.2, %v483_v20  ;;  %v949_v34 = vpop.f32.mrb[8].mxu0 }
  0xf6   : > { %v907_v30 = vpack.c.bf16 %v580_v21, %v580_v21  ;;  %v889_v31 = vpack.c.bf16 %v562_v23, %v562_v23  ;;  %v581_v32 = vmax.f32 %v491_v14, %v549_v24  ;;  %v563_v33 = vmax.f32 %v419_v15, %v531_v25  ;;  %v965_v39 = vpop.f32.mrb[8].mxu1  ;;  %v431_v40 = vpop.f32.mrb[9].mxu0 }
  0xf7   : > { %725 = vst.msk [vmem:[%s1105_s27 + $0x18] sm:$0xf] %vm718_vm3, %v891_v26  ;;  %v905_v35 = vpack.c.bf16 %v578_v27, %v578_v27  ;;  %v892_v36 = vpack.c.bf16 %v565_v28, %v565_v28  ;;  %v579_v37 = vmax.f32 %v483_v20, %v547_v29  ;;  %v440_v38 = vadd.f32 %v949_v34, %v1090_v22  ;;  %v495_v45 = vpop.f32.mrb[9].mxu1  ;;  %v950_v46 = vpop.f32.mrb[10].mxu0 }
  0xf8   : > { %741 = vst.msk [vmem:[%s1105_s27 + $0x58] sm:$0xf] %vm718_vm3, %v907_v30  ;;  %723 = vst.msk [vmem:[%s1105_s27 + $0x10] sm:$0xf] %vm718_vm3, %v889_v31  ;;  %v908_v41 = vpack.c.bf16 %v581_v32, %v581_v32  ;;  %v890_v42 = vpack.c.bf16 %v563_v33, %v563_v33  ;;  %v504_v43 = vadd.f32 %v965_v39, %v1090_v22  ;;  %v966_v51 = vpop.f32.mrb[10].mxu1  ;;  %v434_v52 = vpop.f32.mrb[11].mxu0 }
  0xf9   : > { %v432_v44 = vadd.f32 %v1090_v22, %v431_v40  ;;  %739 = vst.msk [vmem:[%s1105_s27 + $0x50] sm:$0xf] %vm718_vm3, %v905_v35  ;;  %726 = vst.msk [vmem:[%s1105_s27 + $0x1c] sm:$0xf] %vm718_vm3, %v892_v36  ;;  %v906_v47 = vpack.c.bf16 %v579_v37, %v579_v37  ;;  %v536_v48 = vmul.f32 0.2, %v440_v38  ;;  %v496_v49 = vadd.f32 %v1090_v22, %v495_v45 }
  0xfa   : > { %v443_v50 = vadd.f32 %v950_v46, %v1090_v22  ;;  %742 = vst.msk [vmem:[%s1105_s27 + $0x5c] sm:$0xf] %vm718_vm3, %v908_v41  ;;  %724 = vst.msk [vmem:[%s1105_s27 + $0x14] sm:$0xf] %vm718_vm3, %v890_v42  ;;  %v552_v53 = vmul.f32 0.2, %v504_v43  ;;  %v507_v55 = vadd.f32 %v966_v51, %v1090_v22  ;;  %v435_v56 = vadd.f32 %v1090_v22, %v434_v52 }
  0xfb   : > { %v534_v54 = vmul.f32 0.2, %v432_v44  ;;  %v498_v57 = vpop.f32.mrb[11].mxu1  ;;  %740 = vst.msk [vmem:[%s1105_s27 + $0x54] sm:$0xf] %vm718_vm3, %v906_v47  ;;  %v568_v58 = vmax.f32 %v440_v38, %v536_v48 }
  0xfc   : > { %v550_v59 = vmul.f32 0.2, %v496_v49  ;;  %v537_v60 = vmul.f32 0.2, %v443_v50  ;;  %v499_v61 = vadd.f32 %v1090_v22, %v498_v57  ;;  %v584_v62 = vmax.f32 %v504_v43, %v552_v53 }
  0xfd   : > { %v566_v63 = vmax.f32 %v432_v44, %v534_v54  ;;  %v553_v0 = vmul.f32 0.2, %v507_v55  ;;  %v535_v1 = vmul.f32 0.2, %v435_v56  ;;  %v895_v2 = vpack.c.bf16 %v568_v58, %v568_v58  ;;  %v953_v10 = vpop.f32.mrb[12].mxu0 }
  0xfe   : > { %v582_v3 = vmax.f32 %v496_v49, %v550_v59  ;;  %v569_v4 = vmax.f32 %v443_v50, %v537_v60  ;;  %v551_v5 = vmul.f32 0.2, %v499_v61  ;;  %v911_v6 = vpack.c.bf16 %v584_v62, %v584_v62  ;;  %v969_v15 = vpop.f32.mrb[12].mxu1  ;;  %v447_v16 = vpop.f32.mrb[13].mxu0 }
  0xff   : > { %v893_v7 = vpack.c.bf16 %v566_v63, %v566_v63  ;;  %v585_v8 = vmax.f32 %v507_v55, %v553_v0  ;;  %v567_v9 = vmax.f32 %v435_v56, %v535_v1  ;;  %729 = vst.msk [vmem:[%s1105_s27 + $0x28] sm:$0xf] %vm718_vm3, %v895_v2  ;;  %v456_v14 = vadd.f32 %v953_v10, %v1090_v22  ;;  %v511_v21 = vpop.f32.mrb[13].mxu1  ;;  %v954_v23 = vpop.f32.mrb[14].mxu0 }
 0x100   : > { %v909_v11 = vpack.c.bf16 %v582_v3, %v582_v3  ;;  %v896_v12 = vpack.c.bf16 %v569_v4, %v569_v4  ;;  %v583_v13 = vmax.f32 %v499_v61, %v551_v5  ;;  %745 = vst.msk [vmem:[%s1105_s27 + $0x68] sm:$0xf] %vm718_vm3, %v911_v6  ;;  %v520_v19 = vadd.f32 %v969_v15, %v1090_v22  ;;  %v970_v28 = vpop.f32.mrb[14].mxu1  ;;  %v450_v29 = vpop.f32.mrb[15].mxu0 }
 0x101   : > { %727 = vst.msk [vmem:[%s1105_s27 + $0x20] sm:$0xf] %vm718_vm3, %v893_v7  ;;  %v912_v17 = vpack.c.bf16 %v585_v8, %v585_v8  ;;  %v894_v18 = vpack.c.bf16 %v567_v9, %v567_v9  ;;  %v448_v20 = vadd.f32 %v1090_v22, %v447_v16  ;;  %v540_v25 = vmul.f32 0.2, %v456_v14  ;;  %v514_v34 = vpop.f32.mrb[15].mxu1 }
 0x102   : > { %743 = vst.msk [vmem:[%s1105_s27 + $0x60] sm:$0xf] %vm718_vm3, %v909_v11  ;;  %730 = vst.msk [vmem:[%s1105_s27 + $0x2c] sm:$0xf] %vm718_vm3, %v896_v12  ;;  %v910_v24 = vpack.c.bf16 %v583_v13, %v583_v13  ;;  %v512_v26 = vadd.f32 %v1090_v22, %v511_v21  ;;  %v459_v27 = vadd.f32 %v954_v23, %v1090_v22  ;;  %v556_v30 = vmul.f32 0.2, %v520_v19 }
 0x103   : > { %746 = vst.msk [vmem:[%s1105_s27 + $0x6c] sm:$0xf] %vm718_vm3, %v912_v17  ;;  %728 = vst.msk [vmem:[%s1105_s27 + $0x24] sm:$0xf] %vm718_vm3, %v894_v18  ;;  %v538_v31 = vmul.f32 0.2, %v448_v20  ;;  %v523_v32 = vadd.f32 %v970_v28, %v1090_v22  ;;  %v451_v33 = vadd.f32 %v1090_v22, %v450_v29  ;;  %v572_v35 = vmax.f32 %v456_v14, %v540_v25 }
 0x104   : > { %744 = vst.msk [vmem:[%s1105_s27 + $0x64] sm:$0xf] %vm718_vm3, %v910_v24  ;;  %v554_v36 = vmul.f32 0.2, %v512_v26  ;;  %v541_v37 = vmul.f32 0.2, %v459_v27  ;;  %v515_v38 = vadd.f32 %v1090_v22, %v514_v34  ;;  %v588_v39 = vmax.f32 %v520_v19, %v556_v30 }
 0x105   : > { %v570_v40 = vmax.f32 %v448_v20, %v538_v31  ;;  %v557_v41 = vmul.f32 0.2, %v523_v32  ;;  %v539_v42 = vmul.f32 0.2, %v451_v33  ;;  %v899_v43 = vpack.c.bf16 %v572_v35, %v572_v35 }
 0x106   : > { %v586_v44 = vmax.f32 %v512_v26, %v554_v36  ;;  %v573_v45 = vmax.f32 %v459_v27, %v541_v37  ;;  %v555_v46 = vmul.f32 0.2, %v515_v38  ;;  %v915_v47 = vpack.c.bf16 %v588_v39, %v588_v39 }
 0x107   : > { %v897_v48 = vpack.c.bf16 %v570_v40, %v570_v40  ;;  %v589_v49 = vmax.f32 %v523_v32, %v557_v41  ;;  %v571_v50 = vmax.f32 %v451_v33, %v539_v42  ;;  %733 = vst.msk [vmem:[%s1105_s27 + $0x38] sm:$0xf] %vm718_vm3, %v899_v43 }
 0x108   : > { %v913_v22 = vpack.c.bf16 %v586_v44, %v586_v44  ;;  %v900_v51 = vpack.c.bf16 %v573_v45, %v573_v45  ;;  %v587_v52 = vmax.f32 %v515_v38, %v555_v46  ;;  %749 = vst.msk [vmem:[%s1105_s27 + $0x78] sm:$0xf] %vm718_vm3, %v915_v47 }
 0x109   : > { %731 = vst.msk [vmem:[%s1105_s27 + $0x30] sm:$0xf] %vm718_vm3, %v897_v48  ;;  %v916_v53 = vpack.c.bf16 %v589_v49, %v589_v49  ;;  %v898_v54 = vpack.c.bf16 %v571_v50, %v571_v50 }
 0x10a   : > { %747 = vst.msk [vmem:[%s1105_s27 + $0x70] sm:$0xf] %vm718_vm3, %v913_v22  ;;  %734 = vst.msk [vmem:[%s1105_s27 + $0x3c] sm:$0xf] %vm718_vm3, %v900_v51  ;;  %v914_v55 = vpack.c.bf16 %v587_v52, %v587_v52 }
 0x10b   : > { %750 = vst.msk [vmem:[%s1105_s27 + $0x7c] sm:$0xf] %vm718_vm3, %v916_v53  ;;  %732 = vst.msk [vmem:[%s1105_s27 + $0x34] sm:$0xf] %vm718_vm3, %v898_v54 }
 0x10c   : > { %748 = vst.msk [vmem:[%s1105_s27 + $0x74] sm:$0xf] %vm718_vm3, %v914_v55 }
 0x10d PF: > { %s13_s12 = sadd.s32 1, %s1008_s12  }
 0x10e   : > { %p10_p4 = scmp.ge.s32.totalorder %s13_s12, 4  }
 0x110   :  { %12 = sbr.rel (!%p10_p4) target bundleno = 1 (0x1), region = 62 }

// kernel: discriminator_forward.4
= control target key start
LH: loop header
LB: loop body
LE: loop exit
PB: predicated region body
PF: predicated region fallthrough
CT: control target
= control target key end

     0   :  { %s1241_s12 = smov 0   ;;  %s1400_s0 = inlined_call_operand.vmem [shape: bf16[128,576], index: 0, kind: input, shape index: {}]   ;;  %s1401_s1 = inlined_call_operand.vmem [shape: bf16[576,128], index: 1, kind: input, shape index: {}]   ;;  %s1402_s2 = inlined_call_operand.vmem [shape: f32[1,128], index: 2, kind: input, shape index: {}]   ;;  %s1403_s3 = inlined_call_operand.vmem [shape: bf16[128,128], index: 3, kind: output, shape index: {}]  }
   0x1 LB: > { %s917_s13 = sadd.s32 4294967295, %s1219_s12   ;;  %p921_p0 = scmp.ge.s32.totalorder %s1219_s12, 1  ;;  %s1219_s12 = sphi %s1241_s12, %s13_s12  }
   0x2   : > { %p139_p1 = scmp.lt.s32.totalorder %s1219_s12, 3 }
   0x4   : > { %p140_p2 = pnand %p921_p0, %p139_p1 }
   0x5   : > { %v1149_v0 = vld [vmem:[%s1401_s1 + $0x40] sm:$0xff] (!%p140_p2)   ;;  %v1153_v4 = vld [vmem:[%s1401_s1 + $0x48] sm:$0xff] (!%p140_p2)   ;;  %v1157_v8 = vld [vmem:[%s1401_s1 + $0x50] sm:$0xff] (!%p140_p2)   ;;  %s922_s19 = sshll.u32 (!%p140_p2), %s917_s13, 3  ;;  %vm597_vm0 = vcmask (!%p140_p2), 523264  }
   0x6   : > { %143 = sbr.rel (%p140_p2) target bundleno = 296 (0x128), region = 32  ;;  %v1150_v1 = vld [vmem:[%s1401_s1 + $0xc0] sm:$0xff] (!%p140_p2)   ;;  %1028 = vmatprep.subr.bf16.mxu0 (!%p140_p2), %v1149_v0  ;;  %v1154_v5 = vld [vmem:[%s1401_s1 + $0xc8] sm:$0xff] (!%p140_p2)   ;;  %v1158_v9 = vld [vmem:[%s1401_s1 + $0xd0] sm:$0xff] (!%p140_p2)   ;;  %p165_p3 = scmp.lt.s32.totalorder (!%p140_p2), %s922_s19, 15 }
   0x7   : > { %v1151_v2 = vld [vmem:[%s1401_s1] sm:$0xff] (!%p140_p2)   ;;  %1068 = vmatprep.subr.bf16.mxu1 (!%p140_p2), %v1150_v1  ;;  %v1155_v6 = vld [vmem:[%s1401_s1 + $0x8] sm:$0xff] (!%p140_p2)   ;;  %v1159_v10 = vld [vmem:[%s1401_s1 + $0x10] sm:$0xff] (!%p140_p2)  }
   0x8   : > { %v1152_v3 = vld [vmem:[%s1401_s1 + $0x80] sm:$0xff] (!%p140_p2)   ;;  %1029 = vmatpush3.bf16.msra.mxu0 (!%p140_p2), %v1151_v2  ;;  %v1156_v7 = vld [vmem:[%s1401_s1 + $0x88] sm:$0xff] (!%p140_p2)   ;;  %v1160_v11 = vld [vmem:[%s1401_s1 + $0x90] sm:$0xff] (!%p140_p2)  }
   0x9   : > { %1069 = vmatpush3.bf16.msra.mxu1 (!%p140_p2), %v1152_v3  ;;  %1030 = vmatprep.subr.bf16.mxu0 (!%p140_p2), %v1153_v4  ;;  %v1161_v12 = vld [vmem:[%s1401_s1 + $0x58] sm:$0xff] (!%p140_p2)   ;;  %v1165_v16 = vld [vmem:[%s1401_s1 + $0x60] sm:$0xff] (!%p140_p2)   ;;  %v1169_v20 = vld [vmem:[%s1401_s1 + $0x68] sm:$0xff] (!%p140_p2)  }
   0xa   : > { %1070 = vmatprep.subr.bf16.mxu1 (!%p140_p2), %v1154_v5  ;;  %v1162_v13 = vld [vmem:[%s1401_s1 + $0xd8] sm:$0xff] (!%p140_p2)   ;;  %v1166_v17 = vld [vmem:[%s1401_s1 + $0xe0] sm:$0xff] (!%p140_p2)   ;;  %v1170_v21 = vld [vmem:[%s1401_s1 + $0xe8] sm:$0xff] (!%p140_p2)  }
   0xb   : > { %v1163_v14 = vld [vmem:[%s1401_s1 + $0x18] sm:$0xff] (!%p140_p2)   ;;  %v1167_v18 = vld [vmem:[%s1401_s1 + $0x20] sm:$0xff] (!%p140_p2)   ;;  %v1171_v22 = vld [vmem:[%s1401_s1 + $0x28] sm:$0xff] (!%p140_p2)  }
   0xc   : > { %1031 = vmatpush3.bf16.msra.mxu0 (!%p140_p2), %v1155_v6  ;;  %v1164_v15 = vld [vmem:[%s1401_s1 + $0x98] sm:$0xff] (!%p140_p2)   ;;  %v1168_v19 = vld [vmem:[%s1401_s1 + $0xa0] sm:$0xff] (!%p140_p2)   ;;  %v1172_v23 = vld [vmem:[%s1401_s1 + $0xa8] sm:$0xff] (!%p140_p2)  }
   0xd   : > { %1071 = vmatpush3.bf16.msra.mxu1 %v1156_v7  ;;  %1032 = vmatprep.subr.bf16.mxu0 %v1157_v8  ;;  %s1405_s19 = smov (!%p165_p3, %s922_s19), 15  ;;  %v1173_v24 = vld [vmem:[%s1401_s1 + $0x70] sm:$0xff]   ;;  %v1177_v28 = vld [vmem:[%s1401_s1 + $0x78] sm:$0xff]   ;;  %v1187_v36 = vld [vmem:[%s1401_s1 + $0x100] sm:$0xff]  }
   0xe   : > { %1072 = vmatprep.subr.bf16.mxu1 %v1158_v9  ;;  %v1174_v25 = vld [vmem:[%s1401_s1 + $0xf0] sm:$0xff]   ;;  %s1140_s16 = smul.u32 20, %s1405_s19  ;;  %v1178_v29 = vld [vmem:[%s1401_s1 + $0xf8] sm:$0xff]   ;;  %v1194_v39 = vld [vmem:[%s1401_s1 + $0x108] sm:$0xff]   ;;  %s925_s17 = sshll.u32 %s1405_s19, 2 }
   0xf   : > { %v1175_v26 = vld [vmem:[%s1401_s1 + $0x30] sm:$0xff]   ;;  %v1179_v30 = vld [vmem:[%s1401_s1 + $0x38] sm:$0xff]   ;;  %v926_v58 = vld [vmem:[%s1402_s2] ss:$0 sm:$0xff]  ;;  %s175_s21 = scalar_lea.vmem %s1403_s3, %s925_s17 }
  0x10   : > { %1033 = vmatpush3.bf16.msra.mxu0 %v1159_v10  ;;  %v1176_v27 = vld [vmem:[%s1401_s1 + $0xb0] sm:$0xff]   ;;  %s1347_s13 = scalar_lea.vmem %s1400_s0, %s1140_s16  ;;  %v1180_v31 = vld [vmem:[%s1401_s1 + $0xb8] sm:$0xff]  }
  0x11   : > { %1073 = vmatpush3.bf16.msra.mxu1 %v1160_v11  ;;  %1034 = vmatprep.subr.bf16.mxu0 %v1161_v12  ;;  %v1181_v32 = vld [vmem:[%s1347_s13] ss:$20 sps:$4 sm:$0xff]   ;;  %v1183_v33 = vld [vmem:[%s1347_s13 + $0x4] ss:$20 sps:$4 sm:$0xff]   ;;  %v1184_v34 = vld [vmem:[%s1347_s13 + $0x8] ss:$20 sps:$4 sm:$0xff]  }
  0x12   : > { %1074 = vmatprep.subr.bf16.mxu1 %v1162_v13  ;;  %v1186_v35 = vld [vmem:[%s1347_s13 + $0xc] ss:$20 sps:$4 sm:$0xff]   ;;  %642 = vmatprep.mubr.bf16.mxu0 %v1183_v33  ;;  %v1190_v38 = vld [vmem:[%s1347_s13 + $0x34] ss:$20 sps:$4 sm:$0xff]   ;;  %v1193_v41 = vld [vmem:[%s1347_s13 + $0x30] ss:$20 sps:$4 sm:$0xff]  }
  0x13   : > { %707 = vmatprep.mubr.bf16.mxu1 %v1186_v35  ;;  %v1188_v37 = vld [vmem:[%s1347_s13 + $0x2c] ss:$20 sps:$4 sm:$0xff]   ;;  %v1192_v40 = vld [vmem:[%s1347_s13 + $0x28] ss:$20 sps:$4 sm:$0xff]   ;;  %v1201_v44 = vld [vmem:[%s1401_s1 + $0x110] sm:$0xff]  }
  0x14   : > { %1035 = vmatpush3.bf16.msra.mxu0 %v1163_v14  ;;  %v1195_v42 = vld [vmem:[%s1347_s13 + $0x54] ss:$20 sps:$4 sm:$0xff]   ;;  %v1197_v43 = vld [vmem:[%s1347_s13 + $0x5c] ss:$20 sps:$4 sm:$0xff]   ;;  %v1200_v47 = vld [vmem:[%s1347_s13 + $0x58] ss:$20 sps:$4 sm:$0xff]  }
  0x15   : > { %1075 = vmatpush3.bf16.msra.mxu1 %v1164_v15  ;;  %1036 = vmatprep.subr.bf16.mxu0 %v1165_v16  ;;  %v1208_v45 = vld [vmem:[%s1401_s1 + $0x118] sm:$0xff]   ;;  %v1199_v46 = vld [vmem:[%s1347_s13 + $0x50] ss:$20 sps:$4 sm:$0xff]   ;;  %v1207_v51 = vld [vmem:[%s1347_s13 + $0x80] ss:$20 sps:$4 sm:$0xff]  }
  0x16   : > { %1076 = vmatprep.subr.bf16.mxu1 %v1166_v17  ;;  %v1202_v48 = vld [vmem:[%s1347_s13 + $0x7c] ss:$20 sps:$4 sm:$0xff]   ;;  %v1204_v49 = vld [vmem:[%s1347_s13 + $0x84] ss:$20 sps:$4 sm:$0xff]   ;;  %v1210_v53 = vld [vmem:[%s1347_s13 + $0x60] ss:$20 sps:$4 sm:$0xff]  }
  0x17   : > { %v1206_v50 = vld [vmem:[%s1347_s13 + $0x78] ss:$20 sps:$4 sm:$0xff]   ;;  %v1209_v52 = vld [vmem:[%s1347_s13 + $0x10] ss:$20 sps:$4 sm:$0xff]   ;;  %v1212_v55 = vld [vmem:[%s1347_s13 + $0x88] ss:$20 sps:$4 sm:$0xff]  }
  0x18   : > { %1037 = vmatpush3.bf16.msra.mxu0 %v1167_v18  ;;  %v1211_v54 = vld [vmem:[%s1347_s13 + $0x38] ss:$20 sps:$4 sm:$0xff]  }
  0x19   : > { %1077 = vmatpush3.bf16.msra.mxu1 %v1168_v19  ;;  %1038 = vmatprep.subr.bf16.mxu0 %v1169_v20 }
  0x1a   : > { %1078 = vmatprep.subr.bf16.mxu1 %v1170_v21 }
  0x1c   : > { %1039 = vmatpush3.bf16.msra.mxu0 %v1171_v22 }
  0x1d   : > { %1079 = vmatpush3.bf16.msra.mxu1 %v1172_v23  ;;  %1040 = vmatprep.subr.bf16.mxu0 %v1173_v24 }
  0x1e   : > { %1080 = vmatprep.subr.bf16.mxu1 %v1174_v25 }
  0x20   : > { %1041 = vmatpush3.bf16.msra.mxu0 %v1175_v26 }
  0x21   : > { %1081 = vmatpush3.bf16.msra.mxu1 %v1176_v27  ;;  %1042 = vmatprep.subr.bf16.mxu0 %v1177_v28 }
  0x22   : > { %1082 = vmatprep.subr.bf16.mxu1 %v1178_v29 }
  0x24   : > { %1043 = vmatpush3.bf16.msra.mxu0 %v1179_v30 }
  0x25   : > { %1083 = vmatpush3.bf16.msra.mxu1 %v1180_v31  ;;  %1116 = vmatprep.subr.bf16.mxu0 %v1187_v36 }
  0x26   : > { %1132 = vmatprep.subr.bf16.mxu1 %v1187_v36 }
  0x27   : > { %643 = vmatmul.mubr.bf16.vlgmr.msra.gmra.mrb[0].mxu0 %v1181_v32 }
  0x28   : > { %708 = vmatmul.mubr.bf16.vlgmr.msra.gmra.mrb[0].mxu1 %v1184_v34  ;;  %1117 = vmatpush3.bf16.msra.mxu0 %v1187_v36 }
  0x29   : > { %1136 = vmatpush3.bf16.msra.mxu1 %v1187_v36  ;;  %650 = vmatprep.mubr.bf16.mxu0 %v1188_v37 }
  0x2a   : > { %715 = vmatprep.mubr.bf16.mxu1 %v1190_v38  ;;  %1118 = vmatprep.subr.bf16.mxu0 %v1194_v39 }
  0x2b   : > { %1133 = vmatprep.subr.bf16.mxu1 %v1194_v39 }
  0x2c   : > { %1119 = vmatpush3.bf16.msra.mxu0 %v1194_v39 }
  0x2d   : > { %1137 = vmatpush3.bf16.msra.mxu1 %v1194_v39  ;;  %1120 = vmatprep.subr.bf16.mxu0 %v1201_v44 }
  0x2e   : > { %1134 = vmatprep.subr.bf16.mxu1 %v1201_v44 }
  0x2f   : > { %651 = vmatmul.mubr.bf16.gmra.mrb[4].mxu0 %v1192_v40 }
  0x30   : > { %716 = vmatmul.mubr.bf16.gmra.mrb[4].mxu1 %v1193_v41  ;;  %658 = vmatprep.mubr.bf16.mxu0 %v1195_v42 }
  0x31   : > { %723 = vmatprep.mubr.bf16.mxu1 %v1197_v43  ;;  %1121 = vmatpush3.bf16.msra.mxu0 %v1201_v44 }
  0x32   : > { %1138 = vmatpush3.bf16.msra.mxu1 %v1201_v44  ;;  %1122 = vmatprep.subr.bf16.mxu0 %v1208_v45 }
  0x33   : > { %1135 = vmatprep.subr.bf16.mxu1 %v1208_v45 }
  0x35   : > { %1123 = vmatpush3.bf16.msra.mxu0 %v1208_v45 }
  0x36   : > { %1139 = vmatpush3.bf16.msra.mxu1 %v1208_v45 }
  0x37   : > { %659 = vmatmul.mubr.bf16.gmra.mrb[8].mxu0 %v1199_v46 }
  0x38   : > { %724 = vmatmul.mubr.bf16.gmra.mrb[8].mxu1 %v1200_v47  ;;  %666 = vmatprep.mubr.bf16.mxu0 %v1202_v48 }
  0x39   : > { %731 = vmatprep.mubr.bf16.mxu1 %v1204_v49 }
  0x3f   : > { %667 = vmatmul.mubr.bf16.gmra.mrb[12].mxu0 %v1206_v50 }
  0x40   : > { %732 = vmatmul.mubr.bf16.gmra.mrb[12].mxu1 %v1207_v51  ;;  %1124 = vmatprep.mubr.msk.bf16.mxu0 %vm597_vm0, %v1209_v52 }
  0x41   : > { %1128 = vmatprep.mubr.msk.bf16.mxu1 %vm597_vm0, %v1210_v53 }
  0x47   : > { %1125 = vmatmul.mubr.msk.bf16.vlgmr.msra.gmra.mrb[16].mxu0 %vm597_vm0, %v1211_v54 }
  0x48   : > { %1129 = vmatmul.mubr.msk.bf16.vlgmr.msra.gmra.mrb[16].mxu1 %vm597_vm0, %v1212_v55 }
  0xfa   : > { %v1044_v56 = vpop.f32.mrb[0].mxu0 }
  0xfb   : > { %v1084_v57 = vpop.f32.mrb[0].mxu1  ;;  %v1045_v59 = vpop.f32.mrb[1].mxu0 }
  0xfc   : > { %v1046_v60 = vadd.f32 %v1045_v59, %v1044_v56  ;;  %v1085_v61 = vpop.f32.mrb[1].mxu1  ;;  %v1047_v62 = vpop.f32.mrb[2].mxu0 }
  0xfd   : > { %v1086_v63 = vadd.f32 %v1085_v61, %v1084_v57  ;;  %v1087_v0 = vpop.f32.mrb[2].mxu1  ;;  %v1048_v1 = vpop.f32.mrb[3].mxu0 }
  0xfe   : > { %v645_v2 = vadd.f32 %v1046_v60, %v926_v58  ;;  %v1049_v3 = vadd.f32 %v1048_v1, %v1047_v62  ;;  %v1088_v4 = vpop.f32.mrb[3].mxu1 }
  0xff   : > { %v1089_v5 = vadd.f32 %v1088_v4, %v1087_v0 }
 0x100   : > { %v648_v6 = vadd.f32 %v1049_v3, %v926_v58  ;;  %v710_v7 = vadd.f32 %v1086_v63, %v645_v2 }
 0x102   : > { %v1050_v8 = vpop.f32.mrb[4].mxu0  ;;  %v1390_v9 = vadd.f32 %v1089_v5, %v648_v6 }
 0x103   : > { %v1090_v10 = vpop.f32.mrb[4].mxu1  ;;  %v1051_v11 = vpop.f32.mrb[5].mxu0 }
 0x104   : > { %v1052_v12 = vadd.f32 %v1051_v11, %v1050_v8  ;;  %v1091_v13 = vpop.f32.mrb[5].mxu1  ;;  %v1053_v14 = vpop.f32.mrb[6].mxu0 }
 0x105   : > { %v1092_v15 = vadd.f32 %v1091_v13, %v1090_v10  ;;  %v1093_v16 = vpop.f32.mrb[6].mxu1  ;;  %v1054_v17 = vpop.f32.mrb[7].mxu0 }
 0x106   : > { %v653_v18 = vadd.f32 %v1052_v12, %v926_v58  ;;  %v1055_v19 = vadd.f32 %v1054_v17, %v1053_v14  ;;  %v1094_v20 = vpop.f32.mrb[7].mxu1 }
 0x107   : > { %v1095_v21 = vadd.f32 %v1094_v20, %v1093_v16 }
 0x108   : > { %v656_v22 = vadd.f32 %v1055_v19, %v926_v58  ;;  %v718_v23 = vadd.f32 %v1092_v15, %v653_v18 }
 0x10a   : > { %v1056_v24 = vpop.f32.mrb[8].mxu0  ;;  %v721_v25 = vadd.f32 %v1095_v21, %v656_v22 }
 0x10b   : > { %v1096_v26 = vpop.f32.mrb[8].mxu1  ;;  %v1057_v27 = vpop.f32.mrb[9].mxu0 }
 0x10c   : > { %v1058_v28 = vadd.f32 %v1057_v27, %v1056_v24  ;;  %v1097_v29 = vpop.f32.mrb[9].mxu1  ;;  %v1059_v30 = vpop.f32.mrb[10].mxu0 }
 0x10d   : > { %v1098_v31 = vadd.f32 %v1097_v29, %v1096_v26  ;;  %v1099_v32 = vpop.f32.mrb[10].mxu1  ;;  %v1060_v33 = vpop.f32.mrb[11].mxu0 }
 0x10e   : > { %v661_v34 = vadd.f32 %v1058_v28, %v926_v58  ;;  %v1061_v35 = vadd.f32 %v1060_v33, %v1059_v30  ;;  %v1100_v36 = vpop.f32.mrb[11].mxu1 }
 0x10f   : > { %v1101_v37 = vadd.f32 %v1100_v36, %v1099_v32 }
 0x110   : > { %v664_v38 = vadd.f32 %v1061_v35, %v926_v58  ;;  %v726_v39 = vadd.f32 %v1098_v31, %v661_v34 }
 0x112   : > { %v1062_v40 = vpop.f32.mrb[12].mxu0  ;;  %v729_v41 = vadd.f32 %v1101_v37, %v664_v38 }
 0x113   : > { %v1102_v42 = vpop.f32.mrb[12].mxu1  ;;  %v1063_v43 = vpop.f32.mrb[13].mxu0 }
 0x114   : > { %v1064_v44 = vadd.f32 %v1063_v43, %v1062_v40  ;;  %v1103_v45 = vpop.f32.mrb[13].mxu1  ;;  %v1065_v46 = vpop.f32.mrb[14].mxu0 }
 0x115   : > { %v1104_v47 = vadd.f32 %v1103_v45, %v1102_v42  ;;  %v1105_v48 = vpop.f32.mrb[14].mxu1  ;;  %v1066_v49 = vpop.f32.mrb[15].mxu0 }
 0x116   : > { %v669_v50 = vadd.f32 %v1064_v44, %v926_v58  ;;  %v1067_v51 = vadd.f32 %v1066_v49, %v1065_v46  ;;  %v1106_v52 = vpop.f32.mrb[15].mxu1 }
 0x117   : > { %v1107_v53 = vadd.f32 %v1106_v52, %v1105_v48 }
 0x118   : > { %v672_v54 = vadd.f32 %v1067_v51, %v926_v58  ;;  %v734_v55 = vadd.f32 %v1104_v47, %v669_v50 }
 0x11a   : > { %v1126_v56 = vpop.f32.mrb[16].mxu0  ;;  %v737_v57 = vadd.f32 %v1107_v53, %v672_v54 }
 0x11b   : > { %v783_v59 = vadd.f32 %v1126_v56, %v718_v23  ;;  %v1130_v60 = vpop.f32.mrb[16].mxu1  ;;  %v774_v61 = vpop.f32.mrb[17].mxu0 }
 0x11c   : > { %v799_v62 = vadd.f32 %v1130_v60, %v734_v55  ;;  %v775_v63 = vadd.f32 %v774_v61, %v710_v7  ;;  %v790_v0 = vpop.f32.mrb[17].mxu1  ;;  %v1127_v1 = vpop.f32.mrb[18].mxu0 }
 0x11d   : > { %v807_v2 = vmul.f32 0.2, %v783_v59  ;;  %v791_v3 = vadd.f32 %v790_v0, %v726_v39  ;;  %v786_v4 = vadd.f32 %v1127_v1, %v721_v25  ;;  %v1131_v5 = vpop.f32.mrb[18].mxu1  ;;  %v777_v6 = vpop.f32.mrb[19].mxu0 }
 0x11e   : > { %v811_v8 = vmul.f32 0.2, %v799_v62  ;;  %v805_v10 = vmul.f32 0.2, %v775_v63  ;;  %v802_v11 = vadd.f32 %v1131_v5, %v737_v57  ;;  %v778_v58 = vadd.f32 %v777_v6, %v1390_v9  ;;  %v793_v12 = vpop.f32.mrb[19].mxu1 }
 0x11f   : > { %v809_v13 = vmul.f32 0.2, %v791_v3  ;;  %v808_v14 = vmul.f32 0.2, %v786_v4  ;;  %v794_v15 = vadd.f32 %v793_v12, %v729_v41  ;;  %v815_v7 = vmax.f32 %v783_v59, %v807_v2 }
 0x120   : > { %v812_v16 = vmul.f32 0.2, %v802_v11  ;;  %v806_v17 = vmul.f32 0.2, %v778_v58  ;;  %v819_v20 = vmax.f32 %v799_v62, %v811_v8  ;;  %v813_v21 = vmax.f32 %v775_v63, %v805_v10 }
 0x121   : > { %v816_v18 = vmax.f32 %v786_v4, %v808_v14  ;;  %v810_v19 = vmul.f32 0.2, %v794_v15  ;;  %v817_v24 = vmax.f32 %v791_v3, %v809_v13 }
 0x122   : > { %v820_v22 = vmax.f32 %v802_v11, %v812_v16  ;;  %v814_v23 = vmax.f32 %v778_v58, %v806_v17 }
 0x123   : > { %v1013_v9 = vpack.c.bf16 %v816_v18, %v815_v7  ;;  %v818_v25 = vmax.f32 %v794_v15, %v810_v19 }
 0x124   : > { %v1023_v26 = vpack.c.bf16 %v820_v22, %v819_v20  ;;  %v1008_v27 = vpack.c.bf16 %v814_v23, %v813_v21 }
 0x125   : > { %1025 = vst [vmem:[%s175_s21 + $0x8] sm:$0xff] %v1013_v9   ;;  %v1018_v28 = vpack.c.bf16 %v818_v25, %v817_v24 }
 0x126   : > { %1027 = vst [vmem:[%s175_s21 + $0x18] sm:$0xff] %v1023_v26   ;;  %1009 = vst [vmem:[%s175_s21] sm:$0xff] %v1008_v27  }
 0x127   : > { %1026 = vst [vmem:[%s175_s21 + $0x10] sm:$0xff] %v1018_v28  }
 0x128 PF: > { %s13_s12 = sadd.s32 1, %s1219_s12  }
 0x129   : > { %p10_p4 = scmp.ge.s32.totalorder %s13_s12, 4  }
 0x12b   :  { %12 = sbr.rel (!%p10_p4) target bundleno = 1 (0x1), region = 62 }

// kernel: discriminator_forward.5
= control target key start
LH: loop header
LB: loop body
LE: loop exit
PB: predicated region body
PF: predicated region fallthrough
CT: control target
= control target key end

     0   :  { %s2027_s23 = smov 0   ;;  %s2510_s0 = inlined_call_operand.vmem [shape: bf16[32,1152], index: 0, kind: input, shape index: {}]   ;;  %s2511_s1 = inlined_call_operand.vmem [shape: bf16[1152,256], index: 1, kind: input, shape index: {}]   ;;  %s2512_s2 = inlined_call_operand.vmem [shape: f32[1,256], index: 2, kind: input, shape index: {}]   ;;  %s2513_s3 = inlined_call_operand.vmem [shape: f32[16,256], index: 3, kind: input, shape index: {}]   ;;  %s2514_s4 = inlined_call_operand.vmem [shape: f32[1,16], index: 4, kind: input, shape index: {}]   ;;  %s2515_s5 = inlined_call_operand.<no memory space> [shape: f32[1,1], index: 5, kind: input, shape index: {}]   ;;  %s2516_s6 = inlined_call_operand.vmem [shape: f32[2,1,1], index: 6, kind: output, shape index: {}]  }
   0x1   :  { %v11_v0 = vstv %s2515_s5 }
   0x2   :  { %12 = vst [vmem:[#allocation2] sm:$0x1] %v11_v0 }
   0x3 LB: > { %s2033_s24 = sadd.s32 4294967295, %s1985_s23   ;;  %p1556_p0 = scmp.ge.s32.totalorder %s1985_s23, 1  ;;  %s1985_s23 = sphi %s2027_s23, %s18_s23  }
   0x4   : > { %p216_p1 = scmp.lt.s32.totalorder %s1985_s23, 3 }
   0x6   : > { %p217_p2 = pnand %p1556_p0, %p216_p1 }
   0x7   : > { %v1750_v1 = vld [vmem:[%s2511_s1 + $0x4] ss:$8 sps:$4 sm:$0xff] (!%p217_p2)   ;;  %v1754_v3 = vld [vmem:[%s2511_s1] ss:$8 sps:$4 sm:$0xff] (!%p217_p2)   ;;  %v1756_v5 = vld [vmem:[%s2511_s1 + $0x14] ss:$8 sps:$4 sm:$0xff] (!%p217_p2)  }
   0x8   : > { %220 = sbr.rel (%p217_p2) target bundleno = 759 (0x2f7), region = 44  ;;  %v1752_v2 = vld [vmem:[%s2511_s1 + $0x204] ss:$8 sps:$4 sm:$0xff] (!%p217_p2)   ;;  %1188 = vmatprep.subr.bf16.mxu1 (!%p217_p2), %v1750_v1  ;;  %v1755_v4 = vld [vmem:[%s2511_s1 + $0x200] ss:$8 sps:$4 sm:$0xff] (!%p217_p2)   ;;  %s1557_s14 = sshll.u32 (!%p217_p2), %s2033_s24, 1 }
   0x9   : > { %1274 = vmatprep.subr.bf16.mxu0 (!%p217_p2), %v1752_v2  ;;  %1189 = vmatpush1.bf16.msra.mxu1 (!%p217_p2), %v1754_v3  ;;  %v1758_v6 = vld [vmem:[%s2511_s1 + $0x214] ss:$8 sps:$4 sm:$0xff] (!%p217_p2)   ;;  %v1760_v7 = vld [vmem:[%s2511_s1 + $0x10] ss:$8 sps:$4 sm:$0xff] (!%p217_p2)   ;;  %v1762_v9 = vld [vmem:[%s2511_s1 + $0x24] ss:$8 sps:$4 sm:$0xff] (!%p217_p2)  }
   0xa   : > { %1275 = vmatpush1.bf16.msra.mxu0 (!%p217_p2), %v1755_v4  ;;  %1190 = vmatprep.subr.bf16.mxu1 (!%p217_p2), %v1756_v5  ;;  %v1761_v8 = vld [vmem:[%s2511_s1 + $0x210] ss:$8 sps:$4 sm:$0xff] (!%p217_p2)   ;;  %v1764_v10 = vld [vmem:[%s2511_s1 + $0x224] ss:$8 sps:$4 sm:$0xff] (!%p217_p2)   ;;  %v1766_v11 = vld [vmem:[%s2511_s1 + $0x20] ss:$8 sps:$4 sm:$0xff] (!%p217_p2)  }
   0xb   : > { %1276 = vmatprep.subr.bf16.mxu0 (!%p217_p2), %v1758_v6  ;;  %v1767_v12 = vld [vmem:[%s2511_s1 + $0x220] ss:$8 sps:$4 sm:$0xff] (!%p217_p2)   ;;  %v1768_v13 = vld [vmem:[%s2511_s1 + $0x34] ss:$8 sps:$4 sm:$0xff] (!%p217_p2)   ;;  %v1772_v15 = vld [vmem:[%s2511_s1 + $0x30] ss:$8 sps:$4 sm:$0xff] (!%p217_p2)  }
   0xc   : > { %v1770_v14 = vld [vmem:[%s2511_s1 + $0x234] ss:$8 sps:$4 sm:$0xff] (!%p217_p2)   ;;  %v1773_v16 = vld [vmem:[%s2511_s1 + $0x230] ss:$8 sps:$4 sm:$0xff] (!%p217_p2)   ;;  %v1774_v17 = vld [vmem:[%s2511_s1 + $0x44] ss:$8 sps:$4 sm:$0xff] (!%p217_p2)  }
   0xd   : > { %1191 = vmatpush1.bf16.msra.mxu1 (!%p217_p2), %v1760_v7  ;;  %v1776_v18 = vld [vmem:[%s2511_s1 + $0x244] ss:$8 sps:$4 sm:$0xff] (!%p217_p2)   ;;  %v1778_v19 = vld [vmem:[%s2511_s1 + $0x40] ss:$8 sps:$4 sm:$0xff] (!%p217_p2)   ;;  %v1780_v21 = vld [vmem:[%s2511_s1 + $0x54] ss:$8 sps:$4 sm:$0xff] (!%p217_p2)  }
   0xe   : > { %1277 = vmatpush1.bf16.msra.mxu0 (!%p217_p2), %v1761_v8  ;;  %1192 = vmatprep.subr.bf16.mxu1 (!%p217_p2), %v1762_v9  ;;  %v1779_v20 = vld [vmem:[%s2511_s1 + $0x240] ss:$8 sps:$4 sm:$0xff] (!%p217_p2)   ;;  %v1782_v22 = vld [vmem:[%s2511_s1 + $0x254] ss:$8 sps:$4 sm:$0xff] (!%p217_p2)   ;;  %v1784_v23 = vld [vmem:[%s2511_s1 + $0x50] ss:$8 sps:$4 sm:$0xff] (!%p217_p2)  }
   0xf   : > { %1278 = vmatprep.subr.bf16.mxu0 %v1764_v10  ;;  %v1785_v24 = vld [vmem:[%s2511_s1 + $0x250] ss:$8 sps:$4 sm:$0xff]   ;;  %v1786_v25 = vld [vmem:[%s2511_s1 + $0x64] ss:$8 sps:$4 sm:$0xff]   ;;  %v1790_v27 = vld [vmem:[%s2511_s1 + $0x60] ss:$8 sps:$4 sm:$0xff]  }
  0x10   : > { %v1788_v26 = vld [vmem:[%s2511_s1 + $0x264] ss:$8 sps:$4 sm:$0xff]   ;;  %v1791_v28 = vld [vmem:[%s2511_s1 + $0x260] ss:$8 sps:$4 sm:$0xff]   ;;  %v1792_v29 = vld [vmem:[%s2511_s1 + $0x74] ss:$8 sps:$4 sm:$0xff]  }
  0x11   : > { %1193 = vmatpush1.bf16.msra.mxu1 %v1766_v11  ;;  %v1794_v30 = vld [vmem:[%s2511_s1 + $0x274] ss:$8 sps:$4 sm:$0xff]   ;;  %v1796_v31 = vld [vmem:[%s2511_s1 + $0x70] ss:$8 sps:$4 sm:$0xff]   ;;  %v1798_v33 = vld [vmem:[%s2511_s1 + $0x84] ss:$8 sps:$4 sm:$0xff]  }
  0x12   : > { %1279 = vmatpush1.bf16.msra.mxu0 %v1767_v12  ;;  %1194 = vmatprep.subr.bf16.mxu1 %v1768_v13  ;;  %v1797_v32 = vld [vmem:[%s2511_s1 + $0x270] ss:$8 sps:$4 sm:$0xff]   ;;  %p246_p3 = scmp.lt.s32.totalorder %s1557_s14, 3  ;;  %v1800_v34 = vld [vmem:[%s2511_s1 + $0x284] ss:$8 sps:$4 sm:$0xff]   ;;  %vm1420_vm0 = vcmask 130048  }
  0x13   : > { %1280 = vmatprep.subr.bf16.mxu0 %v1770_v14  ;;  %v1802_v35 = vld [vmem:[%s2511_s1 + $0x80] ss:$8 sps:$4 sm:$0xff]   ;;  %v1804_v37 = vld [vmem:[%s2511_s1 + $0x94] ss:$8 sps:$4 sm:$0xff]   ;;  %v1808_v39 = vld [vmem:[%s2511_s1 + $0x90] ss:$8 sps:$4 sm:$0xff]  }
  0x14   : > { %v1803_v36 = vld [vmem:[%s2511_s1 + $0x280] ss:$8 sps:$4 sm:$0xff]   ;;  %s2518_s14 = smov (!%p246_p3, %s1557_s14), 3  ;;  %v1806_v38 = vld [vmem:[%s2511_s1 + $0x294] ss:$8 sps:$4 sm:$0xff]   ;;  %vm1495_vm1 = vcmask 1040384  }
  0x15   : > { %1195 = vmatpush1.bf16.msra.mxu1 %v1772_v15  ;;  %v1809_v40 = vld [vmem:[%s2511_s1 + $0x290] ss:$8 sps:$4 sm:$0xff]   ;;  %v1810_v41 = vld [vmem:[%s2511_s1 + $0xa4] ss:$8 sps:$4 sm:$0xff]   ;;  %s1739_s15 = smul.u32 36, %s2518_s14  ;;  %p252_p4 = scmp.lt.s32.totalorder %s2033_s24, 1 }
  0x16   : > { %1281 = vmatpush1.bf16.msra.mxu0 %v1773_v16  ;;  %1196 = vmatprep.subr.bf16.mxu1 %v1774_v17  ;;  %v1812_v42 = vld [vmem:[%s2511_s1 + $0x2a4] ss:$8 sps:$4 sm:$0xff]   ;;  %v1814_v43 = vld [vmem:[%s2511_s1 + $0xa0] ss:$8 sps:$4 sm:$0xff]   ;;  %v1816_v45 = vld [vmem:[%s2511_s1 + $0xb4] ss:$8 sps:$4 sm:$0xff]  }
  0x17   : > { %1282 = vmatprep.subr.bf16.mxu0 %v1776_v18  ;;  %v1815_v44 = vld [vmem:[%s2511_s1 + $0x2a0] ss:$8 sps:$4 sm:$0xff]   ;;  %s2176_s5 = scalar_lea.vmem %s2510_s0, %s1739_s15  ;;  %v1818_v46 = vld [vmem:[%s2511_s1 + $0x2b4] ss:$8 sps:$4 sm:$0xff]   ;;  %v1820_v47 = vld [vmem:[%s2511_s1 + $0xb0] ss:$8 sps:$4 sm:$0xff]  }
  0x18   : > { %v1821_v48 = vld [vmem:[%s2511_s1 + $0x2b0] ss:$8 sps:$4 sm:$0xff]   ;;  %v1848_v49 = vld [vmem:[%s2176_s5 + $0x4] ss:$36 sps:$4 sm:$0xff]   ;;  %v1828_v55 = vld [vmem:[%s2511_s1 + $0xd4] ss:$8 sps:$4 sm:$0xff]  }
  0x19   : > { %1197 = vmatpush1.bf16.msra.mxu1 %v1778_v19  ;;  %v1822_v50 = vld [vmem:[%s2511_s1 + $0xc4] ss:$8 sps:$4 sm:$0xff]   ;;  %1220 = vmatprep.mubr.bf16.mxu1 %v1848_v49  ;;  %v1854_v52 = vld [vmem:[%s2176_s5 + $0x14] ss:$36 sps:$4 sm:$0xff]   ;;  %v1826_v53 = vld [vmem:[%s2511_s1 + $0xc0] ss:$8 sps:$4 sm:$0xff]  }
  0x1a   : > { %1283 = vmatpush1.bf16.msra.mxu0 %v1779_v20  ;;  %1198 = vmatprep.subr.bf16.mxu1 %v1780_v21  ;;  %v1824_v51 = vld [vmem:[%s2511_s1 + $0x2c4] ss:$8 sps:$4 sm:$0xff]   ;;  %v1827_v54 = vld [vmem:[%s2511_s1 + $0x2c0] ss:$8 sps:$4 sm:$0xff]   ;;  %v1830_v56 = vld [vmem:[%s2511_s1 + $0x2d4] ss:$8 sps:$4 sm:$0xff]  }
  0x1b   : > { %1284 = vmatprep.subr.bf16.mxu0 %v1782_v22  ;;  %1306 = vmatprep.mubr.bf16.mxu0 %v1854_v52  ;;  %v1832_v57 = vld [vmem:[%s2511_s1 + $0xd0] ss:$8 sps:$4 sm:$0xff]   ;;  %v1834_v59 = vld [vmem:[%s2511_s1 + $0xe4] ss:$8 sps:$4 sm:$0xff]   ;;  %v1838_v61 = vld [vmem:[%s2511_s1 + $0xe0] ss:$8 sps:$4 sm:$0xff]  }
  0x1c   : > { %v1833_v58 = vld [vmem:[%s2511_s1 + $0x2d0] ss:$8 sps:$4 sm:$0xff]   ;;  %v1836_v60 = vld [vmem:[%s2511_s1 + $0x2e4] ss:$8 sps:$4 sm:$0xff]   ;;  %v1839_v62 = vld [vmem:[%s2511_s1 + $0x2e0] ss:$8 sps:$4 sm:$0xff]  }
  0x1d   : > { %1199 = vmatpush1.bf16.msra.mxu1 %v1784_v23  ;;  %v1840_v63 = vld [vmem:[%s2511_s1 + $0xf4] ss:$8 sps:$4 sm:$0xff]   ;;  %v1844_v1 = vld [vmem:[%s2511_s1 + $0xf0] ss:$8 sps:$4 sm:$0xff]   ;;  %v1851_v3 = vld [vmem:[%s2511_s1 + $0x104] ss:$8 sps:$4 sm:$0xff]  }
  0x1e   : > { %1285 = vmatpush1.bf16.msra.mxu0 %v1785_v24  ;;  %1200 = vmatprep.subr.bf16.mxu1 %v1786_v25  ;;  %v1842_v0 = vld [vmem:[%s2511_s1 + $0x2f4] ss:$8 sps:$4 sm:$0xff]   ;;  %v1845_v2 = vld [vmem:[%s2511_s1 + $0x2f0] ss:$8 sps:$4 sm:$0xff]   ;;  %v1857_v4 = vld [vmem:[%s2511_s1 + $0x304] ss:$8 sps:$4 sm:$0xff]  }
  0x1f   : > { %1286 = vmatprep.subr.bf16.mxu0 %v1788_v26  ;;  %v1846_v5 = vld [vmem:[%s2176_s5] ss:$36 sps:$4 sm:$0xff]   ;;  %v1852_v7 = vld [vmem:[%s2176_s5 + $0x10] ss:$36 sps:$4 sm:$0xff]   ;;  %s2520_s24 = smov (!%p252_p4, %s2033_s24), 1  ;;  %vm1503_vm2 = vcmask 0  }
  0x20   : > { %v1849_v6 = vld [vmem:[%s2511_s1 + $0x100] ss:$8 sps:$4 sm:$0xff]   ;;  %v1860_v9 = vld [vmem:[%s2511_s1 + $0x114] ss:$8 sps:$4 sm:$0xff]   ;;  %v1858_v11 = vld [vmem:[%s2511_s1 + $0x110] ss:$8 sps:$4 sm:$0xff]   ;;  %s254_s17 = scalar_lea.vmem %s2516_s6, %s2520_s24 }
  0x21   : > { %1201 = vmatpush1.bf16.msra.mxu1 %v1790_v27  ;;  %v1855_v8 = vld [vmem:[%s2511_s1 + $0x300] ss:$8 sps:$4 sm:$0xff]   ;;  %v1863_v10 = vld [vmem:[%s2511_s1 + $0x314] ss:$8 sps:$4 sm:$0xff]   ;;  %v1861_v12 = vld [vmem:[%s2511_s1 + $0x310] ss:$8 sps:$4 sm:$0xff]  }
  0x22   : > { %1287 = vmatpush1.bf16.msra.mxu0 %v1791_v28  ;;  %1202 = vmatprep.subr.bf16.mxu1 %v1792_v29  ;;  %v1866_v13 = vld [vmem:[%s2511_s1 + $0x124] ss:$8 sps:$4 sm:$0xff]   ;;  %v1864_v15 = vld [vmem:[%s2511_s1 + $0x120] ss:$8 sps:$4 sm:$0xff]   ;;  %v1872_v17 = vld [vmem:[%s2511_s1 + $0x134] ss:$8 sps:$4 sm:$0xff]  }
  0x23   : > { %1288 = vmatprep.subr.bf16.mxu0 %v1794_v30  ;;  %v1869_v14 = vld [vmem:[%s2511_s1 + $0x324] ss:$8 sps:$4 sm:$0xff]   ;;  %v1867_v16 = vld [vmem:[%s2511_s1 + $0x320] ss:$8 sps:$4 sm:$0xff]   ;;  %v1875_v18 = vld [vmem:[%s2511_s1 + $0x334] ss:$8 sps:$4 sm:$0xff]  }
  0x24   : > { %v1870_v19 = vld [vmem:[%s2511_s1 + $0x130] ss:$8 sps:$4 sm:$0xff]   ;;  %v1878_v21 = vld [vmem:[%s2511_s1 + $0x144] ss:$8 sps:$4 sm:$0xff]   ;;  %v1876_v23 = vld [vmem:[%s2511_s1 + $0x140] ss:$8 sps:$4 sm:$0xff]  }
  0x25   : > { %1203 = vmatpush1.bf16.msra.mxu1 %v1796_v31  ;;  %v1873_v20 = vld [vmem:[%s2511_s1 + $0x330] ss:$8 sps:$4 sm:$0xff]   ;;  %v1881_v22 = vld [vmem:[%s2511_s1 + $0x344] ss:$8 sps:$4 sm:$0xff]   ;;  %v1879_v24 = vld [vmem:[%s2511_s1 + $0x340] ss:$8 sps:$4 sm:$0xff]  }
  0x26   : > { %1289 = vmatpush1.bf16.msra.mxu0 %v1797_v32  ;;  %1204 = vmatprep.subr.bf16.mxu1 %v1798_v33  ;;  %v1884_v25 = vld [vmem:[%s2511_s1 + $0x154] ss:$8 sps:$4 sm:$0xff]   ;;  %v1882_v27 = vld [vmem:[%s2511_s1 + $0x150] ss:$8 sps:$4 sm:$0xff]   ;;  %v1890_v29 = vld [vmem:[%s2511_s1 + $0x164] ss:$8 sps:$4 sm:$0xff]  }
  0x27   : > { %1290 = vmatprep.subr.bf16.mxu0 %v1800_v34  ;;  %v1887_v26 = vld [vmem:[%s2511_s1 + $0x354] ss:$8 sps:$4 sm:$0xff]   ;;  %v1885_v28 = vld [vmem:[%s2511_s1 + $0x350] ss:$8 sps:$4 sm:$0xff]   ;;  %v1893_v30 = vld [vmem:[%s2511_s1 + $0x364] ss:$8 sps:$4 sm:$0xff]  }
  0x28   : > { %v1888_v31 = vld [vmem:[%s2511_s1 + $0x160] ss:$8 sps:$4 sm:$0xff]   ;;  %v1896_v33 = vld [vmem:[%s2511_s1 + $0x174] ss:$8 sps:$4 sm:$0xff]  }
  0x29   : > { %1205 = vmatpush1.bf16.msra.mxu1 %v1802_v35  ;;  %v1891_v32 = vld [vmem:[%s2511_s1 + $0x360] ss:$8 sps:$4 sm:$0xff]   ;;  %v1899_v34 = vld [vmem:[%s2511_s1 + $0x374] ss:$8 sps:$4 sm:$0xff]   ;;  %v1950_v35 = vld [vmem:[%s2176_s5 + $0xc] ss:$36 sps:$4 sm:$0xff]  }
  0x2a   : > { %1291 = vmatpush1.bf16.msra.mxu0 %v1803_v36  ;;  %1206 = vmatprep.subr.bf16.mxu1 %v1804_v37  ;;  %v1953_v36 = vld [vmem:[%s2176_s5 + $0x1c] ss:$36 sps:$4 sm:$0xff]   ;;  %v1894_v37 = vld [vmem:[%s2511_s1 + $0x170] ss:$8 sps:$4 sm:$0xff]  }
  0x2b   : > { %1292 = vmatprep.subr.bf16.mxu0 %v1806_v38  ;;  %v1897_v38 = vld [vmem:[%s2511_s1 + $0x370] ss:$8 sps:$4 sm:$0xff]   ;;  %v1912_v49 = vld [vmem:[%s2511_s1 + $0x1a0] ss:$8 sps:$4 sm:$0xff]   ;;  %v1923_v52 = vld [vmem:[%s2511_s1 + $0x3b4] ss:$8 sps:$4 sm:$0xff]  }
  0x2d   : > { %1207 = vmatpush1.bf16.msra.mxu1 %v1808_v39  ;;  %v1902_v39 = vld [vmem:[%s2511_s1 + $0x184] ss:$8 sps:$4 sm:$0xff]  }
  0x2e   : > { %1293 = vmatpush1.bf16.msra.mxu0 %v1809_v40  ;;  %1208 = vmatprep.subr.bf16.mxu1 %v1810_v41  ;;  %v1905_v40 = vld [vmem:[%s2511_s1 + $0x384] ss:$8 sps:$4 sm:$0xff]   ;;  %v1900_v41 = vld [vmem:[%s2511_s1 + $0x180] ss:$8 sps:$4 sm:$0xff]  }
  0x2f   : > { %1294 = vmatprep.subr.bf16.mxu0 %v1812_v42  ;;  %v1903_v42 = vld [vmem:[%s2511_s1 + $0x380] ss:$8 sps:$4 sm:$0xff]  }
  0x31   : > { %1209 = vmatpush1.bf16.msra.mxu1 %v1814_v43  ;;  %v1908_v43 = vld [vmem:[%s2511_s1 + $0x194] ss:$8 sps:$4 sm:$0xff]  }
  0x32   : > { %1295 = vmatpush1.bf16.msra.mxu0 %v1815_v44  ;;  %1210 = vmatprep.subr.bf16.mxu1 %v1816_v45  ;;  %v1911_v44 = vld [vmem:[%s2511_s1 + $0x394] ss:$8 sps:$4 sm:$0xff]   ;;  %v1906_v45 = vld [vmem:[%s2511_s1 + $0x190] ss:$8 sps:$4 sm:$0xff]  }
  0x33   : > { %1296 = vmatprep.subr.bf16.mxu0 %v1818_v46  ;;  %v1909_v46 = vld [vmem:[%s2511_s1 + $0x390] ss:$8 sps:$4 sm:$0xff]  }
  0x35   : > { %1211 = vmatpush1.bf16.msra.mxu1 %v1820_v47  ;;  %v1914_v47 = vld [vmem:[%s2511_s1 + $0x1a4] ss:$8 sps:$4 sm:$0xff]  }
  0x36   : > { %1297 = vmatpush1.bf16.msra.mxu0 %v1821_v48  ;;  %1212 = vmatprep.subr.bf16.mxu1 %v1822_v50  ;;  %v1917_v48 = vld [vmem:[%s2511_s1 + $0x3a4] ss:$8 sps:$4 sm:$0xff]   ;;  %v1915_v50 = vld [vmem:[%s2511_s1 + $0x3a0] ss:$8 sps:$4 sm:$0xff]  }
  0x37   : > { %1298 = vmatprep.subr.bf16.mxu0 %v1824_v51  ;;  %v1920_v51 = vld [vmem:[%s2511_s1 + $0x1b4] ss:$8 sps:$4 sm:$0xff]  }
  0x39   : > { %1213 = vmatpush1.bf16.msra.mxu1 %v1826_v53  ;;  %v1918_v53 = vld [vmem:[%s2511_s1 + $0x1b0] ss:$8 sps:$4 sm:$0xff]  }
  0x3a   : > { %1299 = vmatpush1.bf16.msra.mxu0 %v1827_v54  ;;  %1214 = vmatprep.subr.bf16.mxu1 %v1828_v55  ;;  %v1921_v54 = vld [vmem:[%s2511_s1 + $0x3b0] ss:$8 sps:$4 sm:$0xff]   ;;  %v1926_v55 = vld [vmem:[%s2511_s1 + $0x1c4] ss:$8 sps:$4 sm:$0xff]  }
  0x3b   : > { %1300 = vmatprep.subr.bf16.mxu0 %v1830_v56  ;;  %v1929_v56 = vld [vmem:[%s2511_s1 + $0x3c4] ss:$8 sps:$4 sm:$0xff]  }
  0x3d   : > { %1215 = vmatpush1.bf16.msra.mxu1 %v1832_v57  ;;  %v1924_v57 = vld [vmem:[%s2511_s1 + $0x1c0] ss:$8 sps:$4 sm:$0xff]  }
  0x3e   : > { %1301 = vmatpush1.bf16.msra.mxu0 %v1833_v58  ;;  %1216 = vmatprep.subr.bf16.mxu1 %v1834_v59  ;;  %v1927_v58 = vld [vmem:[%s2511_s1 + $0x3c0] ss:$8 sps:$4 sm:$0xff]   ;;  %v1932_v59 = vld [vmem:[%s2511_s1 + $0x1d4] ss:$8 sps:$4 sm:$0xff]  }
  0x3f   : > { %1302 = vmatprep.subr.bf16.mxu0 %v1836_v60  ;;  %v1935_v60 = vld [vmem:[%s2511_s1 + $0x3d4] ss:$8 sps:$4 sm:$0xff]  }
  0x41   : > { %1217 = vmatpush1.bf16.msra.mxu1 %v1838_v61  ;;  %v1930_v61 = vld [vmem:[%s2511_s1 + $0x1d0] ss:$8 sps:$4 sm:$0xff]  }
  0x42   : > { %1303 = vmatpush1.bf16.msra.mxu0 %v1839_v62  ;;  %1218 = vmatprep.subr.bf16.mxu1 %v1840_v63  ;;  %v1933_v62 = vld [vmem:[%s2511_s1 + $0x3d0] ss:$8 sps:$4 sm:$0xff]   ;;  %v1938_v63 = vld [vmem:[%s2511_s1 + $0x1e4] ss:$8 sps:$4 sm:$0xff]  }
  0x43   : > { %1304 = vmatprep.subr.bf16.mxu0 %v1842_v0  ;;  %v1941_v0 = vld [vmem:[%s2511_s1 + $0x3e4] ss:$8 sps:$4 sm:$0xff]  }
  0x45   : > { %1219 = vmatpush1.bf16.msra.mxu1 %v1844_v1  ;;  %v1936_v1 = vld [vmem:[%s2511_s1 + $0x1e0] ss:$8 sps:$4 sm:$0xff]  }
  0x46   : > { %1305 = vmatpush1.bf16.msra.mxu0 %v1845_v2  ;;  %1231 = vmatprep.subr.bf16.mxu1 %v1851_v3  ;;  %v1939_v2 = vld [vmem:[%s2511_s1 + $0x3e0] ss:$8 sps:$4 sm:$0xff]   ;;  %v1944_v3 = vld [vmem:[%s2511_s1 + $0x1f4] ss:$8 sps:$4 sm:$0xff]  }
  0x47   : > { %1317 = vmatprep.subr.bf16.mxu0 %v1857_v4  ;;  %v1947_v4 = vld [vmem:[%s2511_s1 + $0x3f4] ss:$8 sps:$4 sm:$0xff]  }
  0x48   : > { %1221 = vmatmul.mubr.bf16.vlgmr.msra.gmra.mrb[0].mxu1 %v1846_v5  ;;  %v1942_v5 = vld [vmem:[%s2511_s1 + $0x1f0] ss:$8 sps:$4 sm:$0xff]  }
  0x49   : > { %1307 = vmatmul.mubr.bf16.vlgmr.msra.gmra.mrb[0].mxu0 %v1852_v7  ;;  %1232 = vmatpush1.bf16.msra.mxu1 %v1849_v6  ;;  %v1945_v6 = vld [vmem:[%s2511_s1 + $0x3f0] ss:$8 sps:$4 sm:$0xff]   ;;  %v1956_v7 = vld [vmem:[%s2511_s1 + $0x404] ss:$8 sps:$4 sm:$0xff]  }
  0x4a   : > { %1318 = vmatpush1.bf16.msra.mxu0 %v1855_v8  ;;  %1233 = vmatprep.subr.bf16.mxu1 %v1860_v9  ;;  %v1948_v8 = vld [vmem:[%s2176_s5 + $0x8] ss:$36 sps:$4 sm:$0xff]   ;;  %v1951_v9 = vld [vmem:[%s2176_s5 + $0x18] ss:$36 sps:$4 sm:$0xff]  }
  0x4b   : > { %1319 = vmatprep.subr.bf16.mxu0 %v1863_v10  ;;  %1263 = vmatprep.mubr.bf16.mxu1 %v1950_v35  ;;  %v1954_v10 = vld [vmem:[%s2511_s1 + $0x400] ss:$8 sps:$4 sm:$0xff]  }
  0x4c   : > { %1349 = vmatprep.mubr.bf16.mxu0 %v1953_v36  ;;  %v410_v35 = vld [vmem:[%s2512_s2] sm:$0x3] }
  0x4d   : > { %1234 = vmatpush1.bf16.msra.mxu1 %v1858_v11  ;;  %v1959_v11 = vld [vmem:[%s2511_s1 + $0x414] ss:$8 sps:$4 sm:$0xff]  }
  0x4e   : > { %1320 = vmatpush1.bf16.msra.mxu0 %v1861_v12  ;;  %1235 = vmatprep.subr.bf16.mxu1 %v1866_v13  ;;  %v1957_v12 = vld [vmem:[%s2511_s1 + $0x410] ss:$8 sps:$4 sm:$0xff]   ;;  %v1987_v13 = vmov 0  }
  0x4f   : > { %1321 = vmatprep.subr.bf16.mxu0 %v1869_v14  ;;  %v1962_v14 = vld [vmem:[%s2511_s1 + $0x424] ss:$8 sps:$4 sm:$0xff]  }
  0x51   : > { %1236 = vmatpush1.bf16.msra.mxu1 %v1864_v15  ;;  %v1960_v15 = vld [vmem:[%s2511_s1 + $0x420] ss:$8 sps:$4 sm:$0xff]  }
  0x52   : > { %1322 = vmatpush1.bf16.msra.mxu0 %v1867_v16  ;;  %1237 = vmatprep.subr.bf16.mxu1 %v1872_v17  ;;  %v1965_v16 = vld [vmem:[%s2511_s1 + $0x434] ss:$8 sps:$4 sm:$0xff]   ;;  %v1963_v17 = vld [vmem:[%s2511_s1 + $0x430] ss:$8 sps:$4 sm:$0xff]  }
  0x53   : > { %1323 = vmatprep.subr.bf16.mxu0 %v1875_v18  ;;  %v1968_v18 = vld [vmem:[%s2511_s1 + $0x444] ss:$8 sps:$4 sm:$0xff]  }
  0x55   : > { %1238 = vmatpush1.bf16.msra.mxu1 %v1870_v19  ;;  %v1966_v19 = vld [vmem:[%s2511_s1 + $0x440] ss:$8 sps:$4 sm:$0xff]  }
  0x56   : > { %1324 = vmatpush1.bf16.msra.mxu0 %v1873_v20  ;;  %1239 = vmatprep.subr.bf16.mxu1 %v1878_v21  ;;  %v1971_v20 = vld [vmem:[%s2511_s1 + $0x454] ss:$8 sps:$4 sm:$0xff]   ;;  %v1969_v21 = vld [vmem:[%s2511_s1 + $0x450] ss:$8 sps:$4 sm:$0xff]  }
  0x57   : > { %1325 = vmatprep.subr.bf16.mxu0 %v1881_v22  ;;  %v1974_v22 = vld [vmem:[%s2511_s1 + $0x464] ss:$8 sps:$4 sm:$0xff]  }
  0x59   : > { %1240 = vmatpush1.bf16.msra.mxu1 %v1876_v23  ;;  %v1972_v23 = vld [vmem:[%s2511_s1 + $0x460] ss:$8 sps:$4 sm:$0xff]  }
  0x5a   : > { %1326 = vmatpush1.bf16.msra.mxu0 %v1879_v24  ;;  %1241 = vmatprep.subr.bf16.mxu1 %v1884_v25  ;;  %v1977_v24 = vld [vmem:[%s2511_s1 + $0x474] ss:$8 sps:$4 sm:$0xff]   ;;  %v1975_v25 = vld [vmem:[%s2511_s1 + $0x470] ss:$8 sps:$4 sm:$0xff]  }
  0x5b   : > { %1327 = vmatprep.subr.bf16.mxu0 %v1887_v26  ;;  %v1978_v26 = vld [vmem:[%s2176_s5 + $0x20] ss:$36 sps:$4 sm:$0xff]  }
  0x5d   : > { %1242 = vmatpush1.bf16.msra.mxu1 %v1882_v27  ;;  %v1988_v27 = vmov 0.0  }
  0x5e   : > { %1328 = vmatpush1.bf16.msra.mxu0 %v1885_v28  ;;  %1243 = vmatprep.subr.bf16.mxu1 %v1890_v29 }
  0x5f   : > { %1329 = vmatprep.subr.bf16.mxu0 %v1893_v30 }
  0x61   : > { %1244 = vmatpush1.bf16.msra.mxu1 %v1888_v31 }
  0x62   : > { %1330 = vmatpush1.bf16.msra.mxu0 %v1891_v32  ;;  %1245 = vmatprep.subr.bf16.mxu1 %v1896_v33  ;;  %v412_v32 = vlaneseq }
  0x63   : > { %1331 = vmatprep.subr.bf16.mxu0 %v1899_v34 }
  0x64   : > { %v413_v33 = vshrl.u32 %v412_v32, 7 }
  0x65   : > { %1246 = vmatpush1.bf16.msra.mxu1 %v1894_v37 }
  0x66   : > { %1332 = vmatpush1.bf16.msra.mxu0 %v1897_v38  ;;  %1247 = vmatprep.subr.bf16.mxu1 %v1902_v39  ;;  %v414_v34 = vsub.s32 0, %v413_v33  ;;  %v418_v36 = vsub.s32 1, %v413_v33 }
  0x67   : > { %1333 = vmatprep.subr.bf16.mxu0 %v1905_v40 }
  0x68   : > { %v415_v37 = vrot.slane %v410_v35, %v414_v34  ;;  %v419_v38 = vrot.slane %v410_v35, %v418_v36 }
  0x69   : > { %1248 = vmatpush1.bf16.msra.mxu1 %v1900_v41 }
  0x6a   : > { %1334 = vmatpush1.bf16.msra.mxu0 %v1903_v42  ;;  %1249 = vmatprep.subr.bf16.mxu1 %v1908_v43 }
  0x6b   : > { %1335 = vmatprep.subr.bf16.mxu0 %v1911_v44 }
  0x6d   : > { %1250 = vmatpush1.bf16.msra.mxu1 %v1906_v45 }
  0x6e   : > { %1336 = vmatpush1.bf16.msra.mxu0 %v1909_v46  ;;  %1251 = vmatprep.subr.bf16.mxu1 %v1914_v47 }
  0x6f   : > { %1337 = vmatprep.subr.bf16.mxu0 %v1917_v48 }
  0x71   : > { %1252 = vmatpush1.bf16.msra.mxu1 %v1912_v49 }
  0x72   : > { %1338 = vmatpush1.bf16.msra.mxu0 %v1915_v50  ;;  %1253 = vmatprep.subr.bf16.mxu1 %v1920_v51 }
  0x73   : > { %1339 = vmatprep.subr.bf16.mxu0 %v1923_v52 }
  0x75   : > { %1254 = vmatpush1.bf16.msra.mxu1 %v1918_v53 }
  0x76   : > { %1340 = vmatpush1.bf16.msra.mxu0 %v1921_v54  ;;  %1255 = vmatprep.subr.bf16.mxu1 %v1926_v55  ;;  %v1411_v55 = vld [vmem:[%s2513_s3] sm:$0xff] }
  0x77   : > { %1341 = vmatprep.subr.bf16.mxu0 %v1929_v56 }
  0x79   : > { %1256 = vmatpush1.bf16.msra.mxu1 %v1924_v57  ;;  %v1413_v57 = vld [vmem:[%s2513_s3 + $0x10] sm:$0xff] }
  0x7a   : > { %1342 = vmatpush1.bf16.msra.mxu0 %v1927_v58  ;;  %1257 = vmatprep.subr.bf16.mxu1 %v1932_v59  ;;  %v1412_v59 = vld [vmem:[%s2513_s3 + $0x8] sm:$0xff] }
  0x7b   : > { %1343 = vmatprep.subr.bf16.mxu0 %v1935_v60 }
  0x7d   : > { %1258 = vmatpush1.bf16.msra.mxu1 %v1930_v61  ;;  %v1414_v61 = vld [vmem:[%s2513_s3 + $0x18] sm:$0xff] }
  0x7e   : > { %1344 = vmatpush1.bf16.msra.mxu0 %v1933_v62  ;;  %1259 = vmatprep.subr.bf16.mxu1 %v1938_v63 }
  0x7f   : > { %1345 = vmatprep.subr.bf16.mxu0 %v1941_v0 }
  0x81   : > { %1260 = vmatpush1.bf16.msra.mxu1 %v1936_v1 }
  0x82   : > { %1346 = vmatpush1.bf16.msra.mxu0 %v1939_v2  ;;  %1261 = vmatprep.subr.bf16.mxu1 %v1944_v3 }
  0x83   : > { %1347 = vmatprep.subr.bf16.mxu0 %v1947_v4 }
  0x85   : > { %1262 = vmatpush1.bf16.msra.mxu1 %v1942_v5  ;;  %v1419_v5 = vld [vmem:[%s2514_s4] sm:$0x1] }
  0x86   : > { %1348 = vmatpush1.bf16.msra.mxu0 %v1945_v6 }
  0x87   : > { %1360 = vmatprep.subr.bf16.mxu0 %v1956_v7 }
  0x88   : > { %1264 = vmatmul.mubr.bf16.vlgmr.msra.gmra.mrb[0].mxu1 %v1948_v8 }
  0x89   : > { %1350 = vmatmul.mubr.bf16.vlgmr.msra.gmra.mrb[0].mxu0 %v1951_v9  ;;  %1488 = vmatprep.mubr.f32.mxu1 %v1988_v27 }
  0x8a   : > { %1361 = vmatpush1.bf16.msra.mxu0 %v1954_v10  ;;  %1392 = vmatprep.mubr.bf16.mxu0 %v1987_v13 }
  0x8b   : > { %1362 = vmatprep.subr.bf16.mxu0 %v1959_v11  ;;  %v1501_v11 = vld [vmem:[#allocation2] sm:$0x1] }
  0x8e   : > { %1363 = vmatpush1.bf16.msra.mxu0 %v1957_v12 }
  0x8f   : > { %1364 = vmatprep.subr.bf16.mxu0 %v1962_v14 }
  0x92   : > { %1365 = vmatpush1.bf16.msra.mxu0 %v1960_v15 }
  0x93   : > { %1366 = vmatprep.subr.bf16.mxu0 %v1965_v16 }
  0x96   : > { %1367 = vmatpush1.bf16.msra.mxu0 %v1963_v17 }
  0x97   : > { %1368 = vmatprep.subr.bf16.mxu0 %v1968_v18 }
  0x9a   : > { %1369 = vmatpush1.bf16.msra.mxu0 %v1966_v19 }
  0x9b   : > { %1370 = vmatprep.subr.bf16.mxu0 %v1971_v20 }
  0x9e   : > { %1371 = vmatpush1.bf16.msra.mxu0 %v1969_v21 }
  0x9f   : > { %1372 = vmatprep.subr.bf16.mxu0 %v1974_v22 }
  0xa2   : > { %1373 = vmatpush1.bf16.msra.mxu0 %v1972_v23 }
  0xa3   : > { %1374 = vmatprep.subr.bf16.mxu0 %v1977_v24 }
  0xa6   : > { %1375 = vmatpush1.bf16.msra.mxu0 %v1975_v25 }
  0xa9   : > { %1393 = vmatmul.mubr.bf16.vlgmr.msra.gmra.mrb[0].mxu0 %v1978_v26 }
 0x15b   : > { %v1265_v28 = vpop.f32.mrb[0].mxu1 }
 0x15c   : > { %v1267_v29 = vpop.f32.mrb[1].mxu1  ;;  %v1719_v39 = vadd.f32 %v1265_v28, %v415_v37 }
 0x15d   : > { %v1269_v30 = vpop.f32.mrb[2].mxu1  ;;  %v1721_v40 = vadd.f32 %v1267_v29, %v419_v38 }
 0x15e   : > { %v1271_v31 = vpop.f32.mrb[3].mxu1  ;;  %v1723_v42 = vadd.f32 %v1269_v30, %v415_v37 }
 0x15f   : > { %v1725_v45 = vadd.f32 %v1271_v31, %v419_v38 }
 0x17c   : > { %v1394_v41 = vpop.f32.mrb[0].mxu0 }
 0x17d   : > { %v1720_v43 = vadd.f32 %v1719_v39, %v1394_v41  ;;  %v1396_v44 = vpop.f32.mrb[1].mxu0 }
 0x17e   : > { %v1722_v46 = vadd.f32 %v1721_v40, %v1396_v44  ;;  %v1398_v47 = vpop.f32.mrb[2].mxu0 }
 0x17f   : > { %v1403_v48 = vmul.f32 0.2, %v1720_v43  ;;  %v1724_v49 = vadd.f32 %v1723_v42, %v1398_v47  ;;  %v1400_v50 = vpop.f32.mrb[3].mxu0 }
 0x180   : > { %v1404_v51 = vmul.f32 0.2, %v1722_v46  ;;  %v1726_v52 = vadd.f32 %v1725_v45, %v1400_v50 }
 0x181   : > { %v1407_v53 = vmax.f32 %v1720_v43, %v1403_v48  ;;  %v1405_v54 = vmul.f32 0.2, %v1724_v49 }
 0x182   : > { %v1408_v56 = vmax.f32 %v1722_v46, %v1404_v51  ;;  %v1406_v58 = vmul.f32 0.2, %v1726_v52 }
 0x183   : > { %v1409_v60 = vmax.f32 %v1724_v49, %v1405_v54  ;;  %v1415_v63 = vmul.f32 %v1411_v55, %v1407_v53 }
 0x184   : > { %v1410_v62 = vmax.f32 %v1726_v52, %v1406_v58  ;;  %v1416_v1 = vmul.f32 %v1412_v59, %v1408_v56 }
 0x185   : > { %v1417_v0 = vmul.f32 %v1413_v57, %v1409_v60 }
 0x186   : > { %v1418_v2 = vmul.f32 %v1414_v61, %v1410_v62 }
 0x187   : > { %v1717_v3 = vpack.c.bf16 %v1417_v0, %v1415_v63 }
 0x188   : > { %v1715_v4 = vpack.c.bf16 %v1418_v2, %v1416_v1 }
 0x18a   : > { %1716 = vmatprep.subr.bf16.mxu1 %v1715_v4 }
 0x18b   : > { %1718 = vmatpush1.bf16.msra.mxu1 %v1717_v3 }
 0x18e   : > { %1712 = vmatmul.mubr.msk.f32.vlgmr.msra.gmra.mrb[4].mxu1 %vm1420_vm0, %v1419_v5 }
 0x261   : > { %v1490_v6 = vpop.f32.mrb[4].mxu1 }
 0x262   : > { %v1496_v7 = vsel %vm1495_vm1, %v1490_v6, 0.0  ;;  %v1492_v8 = vpop.f32.mrb[5].mxu1 }
 0x263   : > { %v1497_v9 = vsel %vm1495_vm1, %v1492_v8, 0.0 }
 0x264   : > { %v1498_v10 = vadd.f32 %v1497_v9, %v1496_v7 }
 0x266   : > { %1499 = vadd.xlane.f32.xlu0 %v1498_v10 }
 0x2f3   : > { %v1500_v12 = vpop.xlane.xlu0 %1499 }
 0x2f4   : > { %v1502_v13 = vadd.f32 %v1501_v11, %v1500_v12 }
 0x2f6   : > { %1504 = vst.msk [vmem:[%s254_s17] sm:$0x1] %vm1503_vm2, %v1502_v13 }
 0x2f7 PF: > { %s18_s23 = sadd.s32 1, %s1985_s23  }
 0x2f8   : > { %p15_p5 = scmp.ge.s32.totalorder %s18_s23, 4  }
 0x2fa   :  { %17 = sbr.rel (!%p15_p5) target bundleno = 3 (0x3), region = 74 }

</bundles_post_ra>
